<compile_context>
chip_gen: v7x
topology: tpu7x:2x2x1
jax: 0.10.0
libtpu: 0.0.40
codegen_flags: <defaults>
</compile_context>

<pallas_src>
from functools import partial

import jax
import jax.numpy as jnp
from jax import lax
from jax.experimental import pallas as pl
from jax.experimental.pallas import tpu as pltpu

EPS = 1e-5


# ------------------------------- kernel body --------------------------------

def _conv3x3(xpad, w_ref, rows, cols):
    """3x3 stride-1 'valid' conv on an already-padded bf16 value.

    xpad : (rows+2, cols+2, Cin) bf16 value
    w_ref: (3, 3, Cin, Cout) bf16 ref (resident, BN scale folded in)
    returns (rows, cols, Cout) f32
    """
    cin = xpad.shape[-1]
    cout = w_ref.shape[-1]
    acc = None
    for dy in range(3):
        for dx in range(3):
            patch = xpad[dy:dy + rows, dx:dx + cols, :].reshape(rows * cols, cin)
            contrib = jnp.dot(patch, w_ref[dy, dx],
                              preferred_element_type=jnp.float32)
            acc = contrib if acc is None else acc + contrib   # seeded accumulator
    return acc.reshape(rows, cols, cout)


def _resnet_block_kernel(x_ref, halo_ref, w1_ref, t1_ref, w2_ref, t2_ref,
                         o_ref, xpad_ref, ypad_ref):
    th, w, c = x_ref.shape              # body tile (TILE_H, W, C)
    i = pl.program_id(1)                # H-tile index

    # ---- assemble reflection-padded conv1 input (TILE_H+4, W+2, C) ----------
    # Body + halo rows go to columns [1:W+1]; W reflection (pad=1) fills cols
    # 0 and W+1 from padded cols 2 and W-1.  Every element is rewritten each
    # grid step, so no cross-iteration state is carried.
    xpad_ref[2:th + 2, 1:w + 1, :] = x_ref[...]
    xpad_ref[0:2, 1:w + 1, :] = halo_ref[0:2, :, :]
    xpad_ref[th + 2:th + 4, 1:w + 1, :] = halo_ref[2:4, :, :]
    xpad_ref[:, 0:1, :] = xpad_ref[:, 2:3, :]
    xpad_ref[:, w + 1:w + 2, :] = xpad_ref[:, w - 1:w, :]

    # ---- conv1 (BN1 scale folded into w1) + shift + ReLU, TILE_H+2 rows -----
    xp = xpad_ref[...].astype(jnp.bfloat16)          # single cast feeding MXU
    y = _conv3x3(xp, w1_ref, th + 2, w)
    y = jnp.maximum(y + t1_ref[...].reshape(1, 1, c), 0.0)

    # ---- W-reflection-pad y into the conv2-input scratch --------------------
    ypad_ref[:, 1:w + 1, :] = y
    ypad_ref[:, 0:1, :] = y[:, 1:2, :]
    ypad_ref[:, w + 1:w + 2, :] = y[:, w - 2:w - 1, :]

    # Image-boundary row reflection for conv2 (first / last H tile only):
    # y[-1] := y[1]  and  y[H] := y[H-2].
    @pl.when(i == 0)
    def _():
        ypad_ref[0, :, :] = ypad_ref[2, :, :]

    @pl.when(i == pl.num_programs(1) - 1)
    def _():
        ypad_ref[th + 1, :, :] = ypad_ref[th - 1, :, :]

    # ---- conv2 (BN2 scale folded into w2) + shift + residual + final ReLU ---
    yp = ypad_ref[...].astype(jnp.bfloat16)
    z = _conv3x3(yp, w2_ref, th, w)
    # Residual uses the un-padded x block directly: no shifted slice/relayout,
    # and the f32 x tile was not held live across the two convs.
    o_ref[...] = jnp.maximum(x_ref[...] + z + t2_ref[...].reshape(1, 1, c), 0.0)


# --------------------------------- wrapper ----------------------------------

def _pick_tile_h(H, W, C, budget_bytes=24 * 1024 * 1024):
    """Largest divisor of H whose per-tile VMEM working set fits the budget.

    24 MiB default keeps the double-buffered pipeline comfortably inside a v7x
    TensorCore's 64 MiB VMEM; on v5e/v6e (128 MiB) the budget (and the
    vmem_limit below) can be raised to grow TILE_H further.
    """
    def est(th):
        io = 2 * 2 * th * W * C * 4                               # x in + out, 2-buf
        pads_f32 = ((th + 4) + (th + 2)) * (W + 2) * C * 4        # pad scratches
        pads_bf16 = ((th + 4) + (th + 2)) * (W + 2) * C * 2       # bf16 copies
        temps = 6 * (th + 2) * W * C * 4                          # y/z/acc/taps
        return io + pads_f32 + pads_bf16 + temps
    for th in sorted((d for d in range(1, H + 1) if H % d == 0), reverse=True):
        if est(th) <= budget_bytes:
            return th
    return 1


@partial(jax.jit, static_argnames=("tile_h",))
def resnet_block_forward_nhwc(x, kparams, tile_h=None):
    """x: (N, H, W, C) f32, NHWC end-to-end. Returns (N, H, W, C) f32."""
    N, H, W, C = x.shape
    if tile_h is None:
        tile_h = _pick_tile_h(H, W, C)
    if H % tile_h != 0:
        raise ValueError(f"tile_h={tile_h} must divide H={H}")
    if H < 3 or W < 2:
        raise ValueError("reflection halo needs H >= 3 and W >= 2")
    T = H // tile_h

    # Per-tile halo rows (2 above + 2 below each TILE_H window), with image-top/
    # bottom reflection folded into the row indices, gathered directly from x:
    # (N, T, 4, W, C).  This is the only duplicated input HBM traffic
    # (4/TILE_H of x); the body rows are read exactly once via a blocked spec.
    starts = jnp.arange(T) * tile_h
    idx = jnp.concatenate(
        [starts[:, None] + jnp.array([-2, -1]),
         starts[:, None] + tile_h + jnp.array([0, 1])], axis=1)      # (T, 4)
    idx = jnp.where(idx < 0, -idx, idx)
    idx = jnp.where(idx >= H, 2 * (H - 1) - idx, idx)
    halo = x[:, idx]                                                  # (N,T,4,W,C)

    const_w = lambda n, i: (0, 0, 0, 0)            # resident conv weights
    const_t = lambda n, i: (0, 0)                  # resident shifts

    return pl.pallas_call(
        _resnet_block_kernel,
        out_shape=jax.ShapeDtypeStruct((N, H, W, C), jnp.float32),
        grid=(N, T),
        in_specs=[
            pl.BlockSpec((None, tile_h, W, C), lambda n, i: (n, i, 0, 0)),      # x body
            pl.BlockSpec((None, None, 4, W, C), lambda n, i: (n, i, 0, 0, 0)),  # halo rows
            pl.BlockSpec((3, 3, C, C), const_w),   # w1 (bf16, BN1 scale folded)
            pl.BlockSpec((1, C), const_t),         # t1 (conv bias + BN1 shift)
            pl.BlockSpec((3, 3, C, C), const_w),   # w2 (bf16, BN2 scale folded)
            pl.BlockSpec((1, C), const_t),         # t2
        ],
        out_specs=pl.BlockSpec((None, tile_h, W, C), lambda n, i: (n, i, 0, 0)),
        scratch_shapes=[
            pltpu.VMEM((tile_h + 4, W + 2, C), jnp.float32),   # conv1 padded input
            pltpu.VMEM((tile_h + 2, W + 2, C), jnp.float32),   # conv2 padded input
        ],
        compiler_params=pltpu.CompilerParams(
            dimension_semantics=("parallel", "parallel"),
            vmem_limit_bytes=48 * 1024 * 1024),
    )(x, halo, kparams["w1"], kparams["t1"], kparams["w2"], kparams["t2"])


# ----------------------- deterministic parameter setup ----------------------

def make_params(key, dim):
    ks = jax.random.split(key, 12)
    raw = dict(
        w1=jax.random.normal(ks[0], (dim, dim, 3, 3), jnp.float32) * 0.1,  # OIHW
        b1=jax.random.normal(ks[1], (dim,), jnp.float32) * 0.1,
        g1=jax.random.uniform(ks[2], (dim,), jnp.float32, 0.5, 1.5),
        be1=jax.random.normal(ks[3], (dim,), jnp.float32) * 0.1,
        m1=jax.random.normal(ks[4], (dim,), jnp.float32) * 0.1,
        v1=jax.random.uniform(ks[5], (dim,), jnp.float32, 0.5, 1.5),
        w2=jax.random.normal(ks[6], (dim, dim, 3, 3), jnp.float32) * 0.1,
        b2=jax.random.normal(ks[7], (dim,), jnp.float32) * 0.1,
        g2=jax.random.uniform(ks[8], (dim,), jnp.float32, 0.5, 1.5),
        be2=jax.random.normal(ks[9], (dim,), jnp.float32) * 0.1,
        m2=jax.random.normal(ks[10], (dim,), jnp.float32) * 0.1,
        v2=jax.random.uniform(ks[11], (dim,), jnp.float32, 0.5, 1.5),
    )

    # Fold conv bias + BN(eval) into scale/shift, then fold the scale into the
    # conv weights (in f32, before the bf16 cast):
    #   BN(conv(x; w) + b) = conv(x; w * s) + t,  s = g/sqrt(v+eps),
    #   t = (b - m) * s + be.
    def fold(w_oihw, b, g, be, m, v):
        s = g / jnp.sqrt(v + EPS)
        t = (b - m) * s + be
        w_hwio = jnp.transpose(w_oihw, (2, 3, 1, 0)) * s       # scale over Cout
        return w_hwio.astype(jnp.bfloat16), t.reshape(1, dim)

    w1, t1 = fold(raw["w1"], raw["b1"], raw["g1"], raw["be1"], raw["m1"], raw["v1"])
    w2, t2 = fold(raw["w2"], raw["b2"], raw["g2"], raw["be2"], raw["m2"], raw["v2"])
    kparams = dict(w1=w1, t1=t1, w2=w2, t2=t2)
    return raw, kparams


# ----------------------------- pure-JAX reference ----------------------------

def reference_forward(x_nchw, raw):
    def conv(x, w, b):
        xp = jnp.pad(x, ((0, 0), (0, 0), (1, 1), (1, 1)), mode="reflect")
        y = lax.conv_general_dilated(xp, w, (1, 1), "VALID",
                                     dimension_numbers=("NCHW", "OIHW", "NCHW"))
        return y + b.reshape(1, -1, 1, 1)

    def bn(x, g, be, m, v):
        return (g.reshape(1, -1, 1, 1) * (x - m.reshape(1, -1, 1, 1))
                / jnp.sqrt(v.reshape(1, -1, 1, 1) + EPS) + be.reshape(1, -1, 1, 1))

    y = conv(x_nchw, raw["w1"], raw["b1"])
    y = jax.nn.relu(bn(y, raw["g1"], raw["be1"], raw["m1"], raw["v1"]))
    y = conv(y, raw["w2"], raw["b2"])
    y = bn(y, raw["g2"], raw["be2"], raw["m2"], raw["v2"])
    return jax.nn.relu(x_nchw + y)


if __name__ == "__main__":
    key = jax.random.PRNGKey(0)
    kx, kp = jax.random.split(key)
    N, C, H, W = 2, 4, 16, 16                     # PyTorch-style NCHW test shape
    x_nchw = jax.random.normal(kx, (N, C, H, W), jnp.float32)
    raw, kparams = make_params(kp, C)

    ref = jax.block_until_ready(reference_forward(x_nchw, raw))

    # NHWC at the kernel boundary (transpose only here, to compare layouts).
    x_nhwc = jnp.transpose(x_nchw, (0, 2, 3, 1))

    # Exercise: multi-tile first/last (8), interior tiles (4), single tile (auto).
    for tile_h in (8, 4, None):
        out_nhwc = jax.block_until_ready(
            resnet_block_forward_nhwc(x_nhwc, kparams, tile_h=tile_h))
        out = jnp.transpose(out_nhwc, (0, 3, 1, 2))
        assert out.shape == (N, C, H, W)
        err = float(jnp.max(jnp.abs(out - ref)))
        # bf16 MXU operands (with BN scale folded into bf16 weights) vs f32 ref.
        assert jnp.allclose(out, ref, atol=5e-2, rtol=5e-2), (tile_h, err)

    print("KERNEL_OK")
</pallas_src>

<mosaic_0001>
module attributes {stable_mosaic.version = 11 : i64} {
  func.func @_resnet_block_kernel(%arg0: i32, %arg1: i32, %arg2: memref<1x8x16x4xf32, #tpu.memory_space<vmem>>, %arg3: memref<1x1x4x16x4xf32, #tpu.memory_space<vmem>>, %arg4: memref<3x3x4x4xbf16, #tpu.memory_space<vmem>>, %arg5: memref<1x4xf32, #tpu.memory_space<vmem>>, %arg6: memref<3x3x4x4xbf16, #tpu.memory_space<vmem>>, %arg7: memref<1x4xf32, #tpu.memory_space<vmem>>, %arg8: memref<1x8x16x4xf32, #tpu.memory_space<vmem>>, %arg9: memref<12x18x4xf32, #tpu.memory_space<vmem>>, %arg10: memref<10x18x4xf32, #tpu.memory_space<vmem>>) attributes {dimension_semantics = [#tpu.dimension_semantics<parallel>, #tpu.dimension_semantics<parallel>], iteration_bounds = array<i64: 2, 2>, scalar_prefetch = 0 : i64, scratch_operands = 2 : i64, tpu.core_type = #tpu.core_type<tc>, window_params = [{transform_indices = @transform_0, window_bounds = array<i64: 1, 8, 16, 4>}, {transform_indices = @transform_1, window_bounds = array<i64: 1, 1, 4, 16, 4>}, {pipeline_mode = #tpu.pipeline_mode<synchronous>, transform_indices = @transform_2, window_bounds = array<i64: 3, 3, 4, 4>}, {pipeline_mode = #tpu.pipeline_mode<synchronous>, transform_indices = @transform_3, window_bounds = array<i64: 1, 4>}, {pipeline_mode = #tpu.pipeline_mode<synchronous>, transform_indices = @transform_4, window_bounds = array<i64: 3, 3, 4, 4>}, {pipeline_mode = #tpu.pipeline_mode<synchronous>, transform_indices = @transform_5, window_bounds = array<i64: 1, 4>}, {transform_indices = @transform_6, window_bounds = array<i64: 1, 8, 16, 4>}]} {
    %c0 = arith.constant 0 : index
    %c0_0 = arith.constant 0 : index
    %c0_1 = arith.constant 0 : index
    %c0_2 = arith.constant 0 : index
    %0 = vector.load %arg2[%c0, %c0_0, %c0_1, %c0_2] : memref<1x8x16x4xf32, #tpu.memory_space<vmem>>, vector<1x8x16x4xf32>
    %1 = vector.shape_cast %0 : vector<1x8x16x4xf32> to vector<8x16x4xf32>
    %c2 = arith.constant 2 : index
    %c1 = arith.constant 1 : index
    %c0_3 = arith.constant 0 : index
    %2 = vector.load %arg9[%c2, %c1, %c0_3] : memref<12x18x4xf32, #tpu.memory_space<vmem>>, vector<8x16x4xf32>
    tpu.vector_store %arg9[%c2, %c1, %c0_3], %1 {strides = array<i32>} : memref<12x18x4xf32, #tpu.memory_space<vmem>>, vector<8x16x4xf32>,
    %c0_4 = arith.constant 0 : index
    %c0_5 = arith.constant 0 : index
    %c0_6 = arith.constant 0 : index
    %c0_7 = arith.constant 0 : index
    %c0_8 = arith.constant 0 : index
    %3 = vector.load %arg3[%c0_4, %c0_5, %c0_6, %c0_7, %c0_8] : memref<1x1x4x16x4xf32, #tpu.memory_space<vmem>>, vector<1x1x2x16x4xf32>
    %4 = vector.shape_cast %3 : vector<1x1x2x16x4xf32> to vector<2x16x4xf32>
    %c0_9 = arith.constant 0 : index
    %c1_10 = arith.constant 1 : index
    %c0_11 = arith.constant 0 : index
    %5 = vector.load %arg9[%c0_9, %c1_10, %c0_11] : memref<12x18x4xf32, #tpu.memory_space<vmem>>, vector<2x16x4xf32>
    tpu.vector_store %arg9[%c0_9, %c1_10, %c0_11], %4 {strides = array<i32>} : memref<12x18x4xf32, #tpu.memory_space<vmem>>, vector<2x16x4xf32>,
    %c0_12 = arith.constant 0 : index
    %c0_13 = arith.constant 0 : index
    %c2_14 = arith.constant 2 : index
    %c0_15 = arith.constant 0 : index
    %c0_16 = arith.constant 0 : index
    %6 = vector.load %arg3[%c0_12, %c0_13, %c2_14, %c0_15, %c0_16] : memref<1x1x4x16x4xf32, #tpu.memory_space<vmem>>, vector<1x1x2x16x4xf32>
    %7 = vector.shape_cast %6 : vector<1x1x2x16x4xf32> to vector<2x16x4xf32>
    %c10 = arith.constant 10 : index
    %c1_17 = arith.constant 1 : index
    %c0_18 = arith.constant 0 : index
    %8 = vector.load %arg9[%c10, %c1_17, %c0_18] : memref<12x18x4xf32, #tpu.memory_space<vmem>>, vector<2x16x4xf32>
    tpu.vector_store %arg9[%c10, %c1_17, %c0_18], %7 {strides = array<i32>} : memref<12x18x4xf32, #tpu.memory_space<vmem>>, vector<2x16x4xf32>,
    %c0_19 = arith.constant 0 : index
    %c2_20 = arith.constant 2 : index
    %c0_21 = arith.constant 0 : index
    %9 = vector.load %arg9[%c0_19, %c2_20, %c0_21] : memref<12x18x4xf32, #tpu.memory_space<vmem>>, vector<12x1x4xf32>
    %c0_22 = arith.constant 0 : index
    %c0_23 = arith.constant 0 : index
    %c0_24 = arith.constant 0 : index
    %10 = vector.load %arg9[%c0_22, %c0_23, %c0_24] : memref<12x18x4xf32, #tpu.memory_space<vmem>>, vector<12x1x4xf32>
    tpu.vector_store %arg9[%c0_22, %c0_23, %c0_24], %9 {strides = array<i32>} : memref<12x18x4xf32, #tpu.memory_space<vmem>>, vector<12x1x4xf32>,
    %c0_25 = arith.constant 0 : index
    %c15 = arith.constant 15 : index
    %c0_26 = arith.constant 0 : index
    %11 = vector.load %arg9[%c0_25, %c15, %c0_26] : memref<12x18x4xf32, #tpu.memory_space<vmem>>, vector<12x1x4xf32>
    %c0_27 = arith.constant 0 : index
    %c17 = arith.constant 17 : index
    %c0_28 = arith.constant 0 : index
    %12 = vector.load %arg9[%c0_27, %c17, %c0_28] : memref<12x18x4xf32, #tpu.memory_space<vmem>>, vector<12x1x4xf32>
    tpu.vector_store %arg9[%c0_27, %c17, %c0_28], %11 {strides = array<i32>} : memref<12x18x4xf32, #tpu.memory_space<vmem>>, vector<12x1x4xf32>,
    %c0_29 = arith.constant 0 : index
    %c0_30 = arith.constant 0 : index
    %c0_31 = arith.constant 0 : index
    %13 = vector.load %arg9[%c0_29, %c0_30, %c0_31] : memref<12x18x4xf32, #tpu.memory_space<vmem>>, vector<12x18x4xf32>
    %14 = arith.truncf %13 : vector<12x18x4xf32> to vector<12x18x4xbf16>
    %15 = vector.extract_strided_slice %14 {offsets = [0, 0, 0], sizes = [10, 16, 4], strides = [1, 1, 1]} : vector<12x18x4xbf16> to vector<10x16x4xbf16>
    %16 = vector.shape_cast %15 : vector<10x16x4xbf16> to vector<160x4xbf16>
    %c0_32 = arith.constant 0 : index
    %c0_33 = arith.constant 0 : index
    %c0_34 = arith.constant 0 : index
    %c0_35 = arith.constant 0 : index
    %17 = vector.load %arg4[%c0_32, %c0_33, %c0_34, %c0_35] : memref<3x3x4x4xbf16, #tpu.memory_space<vmem>>, vector<1x1x4x4xbf16>
    %18 = vector.shape_cast %17 : vector<1x1x4x4xbf16> to vector<4x4xbf16>
    %cst = arith.constant dense<0.000000e+00> : vector<160x4xf32>
    %19 = tpu.matmul %16, %18, %cst {dimension_numbers = #tpu.dot_dimension_numbers<[1], [0], [0], [1], [0, 0, 1, 1], [], []>} : vector<160x4xbf16>, vector<4x4xbf16>, vector<160x4xf32> -> vector<160x4xf32>
    %20 = vector.extract_strided_slice %14 {offsets = [0, 1, 0], sizes = [10, 16, 4], strides = [1, 1, 1]} : vector<12x18x4xbf16> to vector<10x16x4xbf16>
    %21 = vector.shape_cast %20 : vector<10x16x4xbf16> to vector<160x4xbf16>
    %c0_36 = arith.constant 0 : index
    %c1_37 = arith.constant 1 : index
    %c0_38 = arith.constant 0 : index
    %c0_39 = arith.constant 0 : index
    %22 = vector.load %arg4[%c0_36, %c1_37, %c0_38, %c0_39] : memref<3x3x4x4xbf16, #tpu.memory_space<vmem>>, vector<1x1x4x4xbf16>
    %23 = vector.shape_cast %22 : vector<1x1x4x4xbf16> to vector<4x4xbf16>
    %cst_40 = arith.constant dense<0.000000e+00> : vector<160x4xf32>
    %24 = tpu.matmul %21, %23, %cst_40 {dimension_numbers = #tpu.dot_dimension_numbers<[1], [0], [0], [1], [0, 0, 1, 1], [], []>} : vector<160x4xbf16>, vector<4x4xbf16>, vector<160x4xf32> -> vector<160x4xf32>
    %25 = arith.addf %19, %24 : vector<160x4xf32>
    %26 = vector.extract_strided_slice %14 {offsets = [0, 2, 0], sizes = [10, 16, 4], strides = [1, 1, 1]} : vector<12x18x4xbf16> to vector<10x16x4xbf16>
    %27 = vector.shape_cast %26 : vector<10x16x4xbf16> to vector<160x4xbf16>
    %c0_41 = arith.constant 0 : index
    %c2_42 = arith.constant 2 : index
    %c0_43 = arith.constant 0 : index
    %c0_44 = arith.constant 0 : index
    %28 = vector.load %arg4[%c0_41, %c2_42, %c0_43, %c0_44] : memref<3x3x4x4xbf16, #tpu.memory_space<vmem>>, vector<1x1x4x4xbf16>
    %29 = vector.shape_cast %28 : vector<1x1x4x4xbf16> to vector<4x4xbf16>
    %cst_45 = arith.constant dense<0.000000e+00> : vector<160x4xf32>
    %30 = tpu.matmul %27, %29, %cst_45 {dimension_numbers = #tpu.dot_dimension_numbers<[1], [0], [0], [1], [0, 0, 1, 1], [], []>} : vector<160x4xbf16>, vector<4x4xbf16>, vector<160x4xf32> -> vector<160x4xf32>
    %31 = arith.addf %25, %30 : vector<160x4xf32>
    %32 = vector.extract_strided_slice %14 {offsets = [1, 0, 0], sizes = [10, 16, 4], strides = [1, 1, 1]} : vector<12x18x4xbf16> to vector<10x16x4xbf16>
    %33 = vector.shape_cast %32 : vector<10x16x4xbf16> to vector<160x4xbf16>
    %c1_46 = arith.constant 1 : index
    %c0_47 = arith.constant 0 : index
    %c0_48 = arith.constant 0 : index
    %c0_49 = arith.constant 0 : index
    %34 = vector.load %arg4[%c1_46, %c0_47, %c0_48, %c0_49] : memref<3x3x4x4xbf16, #tpu.memory_space<vmem>>, vector<1x1x4x4xbf16>
    %35 = vector.shape_cast %34 : vector<1x1x4x4xbf16> to vector<4x4xbf16>
    %cst_50 = arith.constant dense<0.000000e+00> : vector<160x4xf32>
    %36 = tpu.matmul %33, %35, %cst_50 {dimension_numbers = #tpu.dot_dimension_numbers<[1], [0], [0], [1], [0, 0, 1, 1], [], []>} : vector<160x4xbf16>, vector<4x4xbf16>, vector<160x4xf32> -> vector<160x4xf32>
    %37 = arith.addf %31, %36 : vector<160x4xf32>
    %38 = vector.extract_strided_slice %14 {offsets = [1, 1, 0], sizes = [10, 16, 4], strides = [1, 1, 1]} : vector<12x18x4xbf16> to vector<10x16x4xbf16>
    %39 = vector.shape_cast %38 : vector<10x16x4xbf16> to vector<160x4xbf16>
    %c1_51 = arith.constant 1 : index
    %c1_52 = arith.constant 1 : index
    %c0_53 = arith.constant 0 : index
    %c0_54 = arith.constant 0 : index
    %40 = vector.load %arg4[%c1_51, %c1_52, %c0_53, %c0_54] : memref<3x3x4x4xbf16, #tpu.memory_space<vmem>>, vector<1x1x4x4xbf16>
    %41 = vector.shape_cast %40 : vector<1x1x4x4xbf16> to vector<4x4xbf16>
    %cst_55 = arith.constant dense<0.000000e+00> : vector<160x4xf32>
    %42 = tpu.matmul %39, %41, %cst_55 {dimension_numbers = #tpu.dot_dimension_numbers<[1], [0], [0], [1], [0, 0, 1, 1], [], []>} : vector<160x4xbf16>, vector<4x4xbf16>, vector<160x4xf32> -> vector<160x4xf32>
    %43 = arith.addf %37, %42 : vector<160x4xf32>
    %44 = vector.extract_strided_slice %14 {offsets = [1, 2, 0], sizes = [10, 16, 4], strides = [1, 1, 1]} : vector<12x18x4xbf16> to vector<10x16x4xbf16>
    %45 = vector.shape_cast %44 : vector<10x16x4xbf16> to vector<160x4xbf16>
    %c1_56 = arith.constant 1 : index
    %c2_57 = arith.constant 2 : index
    %c0_58 = arith.constant 0 : index
    %c0_59 = arith.constant 0 : index
    %46 = vector.load %arg4[%c1_56, %c2_57, %c0_58, %c0_59] : memref<3x3x4x4xbf16, #tpu.memory_space<vmem>>, vector<1x1x4x4xbf16>
    %47 = vector.shape_cast %46 : vector<1x1x4x4xbf16> to vector<4x4xbf16>
    %cst_60 = arith.constant dense<0.000000e+00> : vector<160x4xf32>
    %48 = tpu.matmul %45, %47, %cst_60 {dimension_numbers = #tpu.dot_dimension_numbers<[1], [0], [0], [1], [0, 0, 1, 1], [], []>} : vector<160x4xbf16>, vector<4x4xbf16>, vector<160x4xf32> -> vector<160x4xf32>
    %49 = arith.addf %43, %48 : vector<160x4xf32>
    %50 = vector.extract_strided_slice %14 {offsets = [2, 0, 0], sizes = [10, 16, 4], strides = [1, 1, 1]} : vector<12x18x4xbf16> to vector<10x16x4xbf16>
    %51 = vector.shape_cast %50 : vector<10x16x4xbf16> to vector<160x4xbf16>
    %c2_61 = arith.constant 2 : index
    %c0_62 = arith.constant 0 : index
    %c0_63 = arith.constant 0 : index
    %c0_64 = arith.constant 0 : index
    %52 = vector.load %arg4[%c2_61, %c0_62, %c0_63, %c0_64] : memref<3x3x4x4xbf16, #tpu.memory_space<vmem>>, vector<1x1x4x4xbf16>
    %53 = vector.shape_cast %52 : vector<1x1x4x4xbf16> to vector<4x4xbf16>
    %cst_65 = arith.constant dense<0.000000e+00> : vector<160x4xf32>
    %54 = tpu.matmul %51, %53, %cst_65 {dimension_numbers = #tpu.dot_dimension_numbers<[1], [0], [0], [1], [0, 0, 1, 1], [], []>} : vector<160x4xbf16>, vector<4x4xbf16>, vector<160x4xf32> -> vector<160x4xf32>
    %55 = arith.addf %49, %54 : vector<160x4xf32>
    %56 = vector.extract_strided_slice %14 {offsets = [2, 1, 0], sizes = [10, 16, 4], strides = [1, 1, 1]} : vector<12x18x4xbf16> to vector<10x16x4xbf16>
    %57 = vector.shape_cast %56 : vector<10x16x4xbf16> to vector<160x4xbf16>
    %c2_66 = arith.constant 2 : index
    %c1_67 = arith.constant 1 : index
    %c0_68 = arith.constant 0 : index
    %c0_69 = arith.constant 0 : index
    %58 = vector.load %arg4[%c2_66, %c1_67, %c0_68, %c0_69] : memref<3x3x4x4xbf16, #tpu.memory_space<vmem>>, vector<1x1x4x4xbf16>
    %59 = vector.shape_cast %58 : vector<1x1x4x4xbf16> to vector<4x4xbf16>
    %cst_70 = arith.constant dense<0.000000e+00> : vector<160x4xf32>
    %60 = tpu.matmul %57, %59, %cst_70 {dimension_numbers = #tpu.dot_dimension_numbers<[1], [0], [0], [1], [0, 0, 1, 1], [], []>} : vector<160x4xbf16>, vector<4x4xbf16>, vector<160x4xf32> -> vector<160x4xf32>
    %61 = arith.addf %55, %60 : vector<160x4xf32>
    %62 = vector.extract_strided_slice %14 {offsets = [2, 2, 0], sizes = [10, 16, 4], strides = [1, 1, 1]} : vector<12x18x4xbf16> to vector<10x16x4xbf16>
    %63 = vector.shape_cast %62 : vector<10x16x4xbf16> to vector<160x4xbf16>
    %c2_71 = arith.constant 2 : index
    %c2_72 = arith.constant 2 : index
    %c0_73 = arith.constant 0 : index
    %c0_74 = arith.constant 0 : index
    %64 = vector.load %arg4[%c2_71, %c2_72, %c0_73, %c0_74] : memref<3x3x4x4xbf16, #tpu.memory_space<vmem>>, vector<1x1x4x4xbf16>
    %65 = vector.shape_cast %64 : vector<1x1x4x4xbf16> to vector<4x4xbf16>
    %cst_75 = arith.constant dense<0.000000e+00> : vector<160x4xf32>
    %66 = tpu.matmul %63, %65, %cst_75 {dimension_numbers = #tpu.dot_dimension_numbers<[1], [0], [0], [1], [0, 0, 1, 1], [], []>} : vector<160x4xbf16>, vector<4x4xbf16>, vector<160x4xf32> -> vector<160x4xf32>
    %67 = arith.addf %61, %66 : vector<160x4xf32>
    %68 = vector.shape_cast %67 : vector<160x4xf32> to vector<10x16x4xf32>
    %c0_76 = arith.constant 0 : index
    %c0_77 = arith.constant 0 : index
    %69 = vector.load %arg5[%c0_76, %c0_77] : memref<1x4xf32, #tpu.memory_space<vmem>>, vector<1x4xf32>
    %70 = vector.shape_cast %69 : vector<1x4xf32> to vector<1x1x4xf32>
    %71 = vector.broadcast %70 : vector<1x1x4xf32> to vector<10x16x4xf32>
    %72 = arith.addf %68, %71 : vector<10x16x4xf32>
    %cst_78 = arith.constant 0.000000e+00 : f32
    %73 = vector.broadcast %cst_78 : f32 to vector<10x16x4xf32>
    %74 = arith.maximumf %72, %73 : vector<10x16x4xf32>
    %c0_79 = arith.constant 0 : index
    %c1_80 = arith.constant 1 : index
    %c0_81 = arith.constant 0 : index
    %75 = vector.load %arg10[%c0_79, %c1_80, %c0_81] : memref<10x18x4xf32, #tpu.memory_space<vmem>>, vector<10x16x4xf32>
    tpu.vector_store %arg10[%c0_79, %c1_80, %c0_81], %74 {strides = array<i32>} : memref<10x18x4xf32, #tpu.memory_space<vmem>>, vector<10x16x4xf32>,
    %76 = vector.extract_strided_slice %74 {offsets = [0, 1, 0], sizes = [10, 1, 4], strides = [1, 1, 1]} : vector<10x16x4xf32> to vector<10x1x4xf32>
    %c0_82 = arith.constant 0 : index
    %c0_83 = arith.constant 0 : index
    %c0_84 = arith.constant 0 : index
    %77 = vector.load %arg10[%c0_82, %c0_83, %c0_84] : memref<10x18x4xf32, #tpu.memory_space<vmem>>, vector<10x1x4xf32>
    tpu.vector_store %arg10[%c0_82, %c0_83, %c0_84], %76 {strides = array<i32>} : memref<10x18x4xf32, #tpu.memory_space<vmem>>, vector<10x1x4xf32>,
    %78 = vector.extract_strided_slice %74 {offsets = [0, 14, 0], sizes = [10, 1, 4], strides = [1, 1, 1]} : vector<10x16x4xf32> to vector<10x1x4xf32>
    %c0_85 = arith.constant 0 : index
    %c17_86 = arith.constant 17 : index
    %c0_87 = arith.constant 0 : index
    %79 = vector.load %arg10[%c0_85, %c17_86, %c0_87] : memref<10x18x4xf32, #tpu.memory_space<vmem>>, vector<10x1x4xf32>
    tpu.vector_store %arg10[%c0_85, %c17_86, %c0_87], %78 {strides = array<i32>} : memref<10x18x4xf32, #tpu.memory_space<vmem>>, vector<10x1x4xf32>,
    %c0_i32 = arith.constant 0 : i32
    %80 = arith.cmpi eq, %arg1, %c0_i32 : i32
    %81 = arith.extui %80 : i1 to i32
    %c0_i32_88 = arith.constant 0 : i32
    %82 = arith.cmpi ne, %81, %c0_i32_88 : i32
    scf.if %82 {
      %c2_149 = arith.constant 2 : index
      %c0_150 = arith.constant 0 : index
      %c0_151 = arith.constant 0 : index
      %154 = vector.load %arg10[%c2_149, %c0_150, %c0_151] : memref<10x18x4xf32, #tpu.memory_space<vmem>>, vector<1x18x4xf32>
      %155 = vector.shape_cast %154 : vector<1x18x4xf32> to vector<18x4xf32>
      %c0_152 = arith.constant 0 : index
      %c0_153 = arith.constant 0 : index
      %c0_154 = arith.constant 0 : index
      %156 = vector.load %arg10[%c0_152, %c0_153, %c0_154] : memref<10x18x4xf32, #tpu.memory_space<vmem>>, vector<1x18x4xf32>
      %157 = vector.shape_cast %156 : vector<1x18x4xf32> to vector<18x4xf32>
      %158 = vector.shape_cast %155 : vector<18x4xf32> to vector<1x18x4xf32>
      tpu.vector_store %arg10[%c0_152, %c0_153, %c0_154], %158 {strides = array<i32>} : memref<10x18x4xf32, #tpu.memory_space<vmem>>, vector<1x18x4xf32>,
    } else {
    }
    %c1_i32 = arith.constant 1 : i32
    %83 = arith.cmpi eq, %arg1, %c1_i32 : i32
    %84 = arith.extui %83 : i1 to i32
    %c0_i32_89 = arith.constant 0 : i32
    %85 = arith.cmpi ne, %84, %c0_i32_89 : i32
    scf.if %85 {
      %c7 = arith.constant 7 : index
      %c0_149 = arith.constant 0 : index
      %c0_150 = arith.constant 0 : index
      %154 = vector.load %arg10[%c7, %c0_149, %c0_150] : memref<10x18x4xf32, #tpu.memory_space<vmem>>, vector<1x18x4xf32>
      %155 = vector.shape_cast %154 : vector<1x18x4xf32> to vector<18x4xf32>
      %c9 = arith.constant 9 : index
      %c0_151 = arith.constant 0 : index
      %c0_152 = arith.constant 0 : index
      %156 = vector.load %arg10[%c9, %c0_151, %c0_152] : memref<10x18x4xf32, #tpu.memory_space<vmem>>, vector<1x18x4xf32>
      %157 = vector.shape_cast %156 : vector<1x18x4xf32> to vector<18x4xf32>
      %158 = vector.shape_cast %155 : vector<18x4xf32> to vector<1x18x4xf32>
      tpu.vector_store %arg10[%c9, %c0_151, %c0_152], %158 {strides = array<i32>} : memref<10x18x4xf32, #tpu.memory_space<vmem>>, vector<1x18x4xf32>,
    } else {
    }
    %c0_90 = arith.constant 0 : index
    %c0_91 = arith.constant 0 : index
    %c0_92 = arith.constant 0 : index
    %86 = vector.load %arg10[%c0_90, %c0_91, %c0_92] : memref<10x18x4xf32, #tpu.memory_space<vmem>>, vector<10x18x4xf32>
    %87 = arith.truncf %86 : vector<10x18x4xf32> to vector<10x18x4xbf16>
    %88 = vector.extract_strided_slice %87 {offsets = [0, 0, 0], sizes = [8, 16, 4], strides = [1, 1, 1]} : vector<10x18x4xbf16> to vector<8x16x4xbf16>
    %89 = vector.shape_cast %88 : vector<8x16x4xbf16> to vector<128x4xbf16>
    %c0_93 = arith.constant 0 : index
    %c0_94 = arith.constant 0 : index
    %c0_95 = arith.constant 0 : index
    %c0_96 = arith.constant 0 : index
    %90 = vector.load %arg6[%c0_93, %c0_94, %c0_95, %c0_96] : memref<3x3x4x4xbf16, #tpu.memory_space<vmem>>, vector<1x1x4x4xbf16>
    %91 = vector.shape_cast %90 : vector<1x1x4x4xbf16> to vector<4x4xbf16>
    %cst_97 = arith.constant dense<0.000000e+00> : vector<128x4xf32>
    %92 = tpu.matmul %89, %91, %cst_97 {dimension_numbers = #tpu.dot_dimension_numbers<[1], [0], [0], [1], [0, 0, 1, 1], [], []>} : vector<128x4xbf16>, vector<4x4xbf16>, vector<128x4xf32> -> vector<128x4xf32>
    %93 = vector.extract_strided_slice %87 {offsets = [0, 1, 0], sizes = [8, 16, 4], strides = [1, 1, 1]} : vector<10x18x4xbf16> to vector<8x16x4xbf16>
    %94 = vector.shape_cast %93 : vector<8x16x4xbf16> to vector<128x4xbf16>
    %c0_98 = arith.constant 0 : index
    %c1_99 = arith.constant 1 : index
    %c0_100 = arith.constant 0 : index
    %c0_101 = arith.constant 0 : index
    %95 = vector.load %arg6[%c0_98, %c1_99, %c0_100, %c0_101] : memref<3x3x4x4xbf16, #tpu.memory_space<vmem>>, vector<1x1x4x4xbf16>
    %96 = vector.shape_cast %95 : vector<1x1x4x4xbf16> to vector<4x4xbf16>
    %cst_102 = arith.constant dense<0.000000e+00> : vector<128x4xf32>
    %97 = tpu.matmul %94, %96, %cst_102 {dimension_numbers = #tpu.dot_dimension_numbers<[1], [0], [0], [1], [0, 0, 1, 1], [], []>} : vector<128x4xbf16>, vector<4x4xbf16>, vector<128x4xf32> -> vector<128x4xf32>
    %98 = arith.addf %92, %97 : vector<128x4xf32>
    %99 = vector.extract_strided_slice %87 {offsets = [0, 2, 0], sizes = [8, 16, 4], strides = [1, 1, 1]} : vector<10x18x4xbf16> to vector<8x16x4xbf16>
    %100 = vector.shape_cast %99 : vector<8x16x4xbf16> to vector<128x4xbf16>
    %c0_103 = arith.constant 0 : index
    %c2_104 = arith.constant 2 : index
    %c0_105 = arith.constant 0 : index
    %c0_106 = arith.constant 0 : index
    %101 = vector.load %arg6[%c0_103, %c2_104, %c0_105, %c0_106] : memref<3x3x4x4xbf16, #tpu.memory_space<vmem>>, vector<1x1x4x4xbf16>
    %102 = vector.shape_cast %101 : vector<1x1x4x4xbf16> to vector<4x4xbf16>
    %cst_107 = arith.constant dense<0.000000e+00> : vector<128x4xf32>
    %103 = tpu.matmul %100, %102, %cst_107 {dimension_numbers = #tpu.dot_dimension_numbers<[1], [0], [0], [1], [0, 0, 1, 1], [], []>} : vector<128x4xbf16>, vector<4x4xbf16>, vector<128x4xf32> -> vector<128x4xf32>
    %104 = arith.addf %98, %103 : vector<128x4xf32>
    %105 = vector.extract_strided_slice %87 {offsets = [1, 0, 0], sizes = [8, 16, 4], strides = [1, 1, 1]} : vector<10x18x4xbf16> to vector<8x16x4xbf16>
    %106 = vector.shape_cast %105 : vector<8x16x4xbf16> to vector<128x4xbf16>
    %c1_108 = arith.constant 1 : index
    %c0_109 = arith.constant 0 : index
    %c0_110 = arith.constant 0 : index
    %c0_111 = arith.constant 0 : index
    %107 = vector.load %arg6[%c1_108, %c0_109, %c0_110, %c0_111] : memref<3x3x4x4xbf16, #tpu.memory_space<vmem>>, vector<1x1x4x4xbf16>
    %108 = vector.shape_cast %107 : vector<1x1x4x4xbf16> to vector<4x4xbf16>
    %cst_112 = arith.constant dense<0.000000e+00> : vector<128x4xf32>
    %109 = tpu.matmul %106, %108, %cst_112 {dimension_numbers = #tpu.dot_dimension_numbers<[1], [0], [0], [1], [0, 0, 1, 1], [], []>} : vector<128x4xbf16>, vector<4x4xbf16>, vector<128x4xf32> -> vector<128x4xf32>
    %110 = arith.addf %104, %109 : vector<128x4xf32>
    %111 = vector.extract_strided_slice %87 {offsets = [1, 1, 0], sizes = [8, 16, 4], strides = [1, 1, 1]} : vector<10x18x4xbf16> to vector<8x16x4xbf16>
    %112 = vector.shape_cast %111 : vector<8x16x4xbf16> to vector<128x4xbf16>
    %c1_113 = arith.constant 1 : index
    %c1_114 = arith.constant 1 : index
    %c0_115 = arith.constant 0 : index
    %c0_116 = arith.constant 0 : index
    %113 = vector.load %arg6[%c1_113, %c1_114, %c0_115, %c0_116] : memref<3x3x4x4xbf16, #tpu.memory_space<vmem>>, vector<1x1x4x4xbf16>
    %114 = vector.shape_cast %113 : vector<1x1x4x4xbf16> to vector<4x4xbf16>
    %cst_117 = arith.constant dense<0.000000e+00> : vector<128x4xf32>
    %115 = tpu.matmul %112, %114, %cst_117 {dimension_numbers = #tpu.dot_dimension_numbers<[1], [0], [0], [1], [0, 0, 1, 1], [], []>} : vector<128x4xbf16>, vector<4x4xbf16>, vector<128x4xf32> -> vector<128x4xf32>
    %116 = arith.addf %110, %115 : vector<128x4xf32>
    %117 = vector.extract_strided_slice %87 {offsets = [1, 2, 0], sizes = [8, 16, 4], strides = [1, 1, 1]} : vector<10x18x4xbf16> to vector<8x16x4xbf16>
    %118 = vector.shape_cast %117 : vector<8x16x4xbf16> to vector<128x4xbf16>
    %c1_118 = arith.constant 1 : index
    %c2_119 = arith.constant 2 : index
    %c0_120 = arith.constant 0 : index
    %c0_121 = arith.constant 0 : index
    %119 = vector.load %arg6[%c1_118, %c2_119, %c0_120, %c0_121] : memref<3x3x4x4xbf16, #tpu.memory_space<vmem>>, vector<1x1x4x4xbf16>
    %120 = vector.shape_cast %119 : vector<1x1x4x4xbf16> to vector<4x4xbf16>
    %cst_122 = arith.constant dense<0.000000e+00> : vector<128x4xf32>
    %121 = tpu.matmul %118, %120, %cst_122 {dimension_numbers = #tpu.dot_dimension_numbers<[1], [0], [0], [1], [0, 0, 1, 1], [], []>} : vector<128x4xbf16>, vector<4x4xbf16>, vector<128x4xf32> -> vector<128x4xf32>
    %122 = arith.addf %116, %121 : vector<128x4xf32>
    %123 = vector.extract_strided_slice %87 {offsets = [2, 0, 0], sizes = [8, 16, 4], strides = [1, 1, 1]} : vector<10x18x4xbf16> to vector<8x16x4xbf16>
    %124 = vector.shape_cast %123 : vector<8x16x4xbf16> to vector<128x4xbf16>
    %c2_123 = arith.constant 2 : index
    %c0_124 = arith.constant 0 : index
    %c0_125 = arith.constant 0 : index
    %c0_126 = arith.constant 0 : index
    %125 = vector.load %arg6[%c2_123, %c0_124, %c0_125, %c0_126] : memref<3x3x4x4xbf16, #tpu.memory_space<vmem>>, vector<1x1x4x4xbf16>
    %126 = vector.shape_cast %125 : vector<1x1x4x4xbf16> to vector<4x4xbf16>
    %cst_127 = arith.constant dense<0.000000e+00> : vector<128x4xf32>
    %127 = tpu.matmul %124, %126, %cst_127 {dimension_numbers = #tpu.dot_dimension_numbers<[1], [0], [0], [1], [0, 0, 1, 1], [], []>} : vector<128x4xbf16>, vector<4x4xbf16>, vector<128x4xf32> -> vector<128x4xf32>
    %128 = arith.addf %122, %127 : vector<128x4xf32>
    %129 = vector.extract_strided_slice %87 {offsets = [2, 1, 0], sizes = [8, 16, 4], strides = [1, 1, 1]} : vector<10x18x4xbf16> to vector<8x16x4xbf16>
    %130 = vector.shape_cast %129 : vector<8x16x4xbf16> to vector<128x4xbf16>
    %c2_128 = arith.constant 2 : index
    %c1_129 = arith.constant 1 : index
    %c0_130 = arith.constant 0 : index
    %c0_131 = arith.constant 0 : index
    %131 = vector.load %arg6[%c2_128, %c1_129, %c0_130, %c0_131] : memref<3x3x4x4xbf16, #tpu.memory_space<vmem>>, vector<1x1x4x4xbf16>
    %132 = vector.shape_cast %131 : vector<1x1x4x4xbf16> to vector<4x4xbf16>
    %cst_132 = arith.constant dense<0.000000e+00> : vector<128x4xf32>
    %133 = tpu.matmul %130, %132, %cst_132 {dimension_numbers = #tpu.dot_dimension_numbers<[1], [0], [0], [1], [0, 0, 1, 1], [], []>} : vector<128x4xbf16>, vector<4x4xbf16>, vector<128x4xf32> -> vector<128x4xf32>
    %134 = arith.addf %128, %133 : vector<128x4xf32>
    %135 = vector.extract_strided_slice %87 {offsets = [2, 2, 0], sizes = [8, 16, 4], strides = [1, 1, 1]} : vector<10x18x4xbf16> to vector<8x16x4xbf16>
    %136 = vector.shape_cast %135 : vector<8x16x4xbf16> to vector<128x4xbf16>
    %c2_133 = arith.constant 2 : index
    %c2_134 = arith.constant 2 : index
    %c0_135 = arith.constant 0 : index
    %c0_136 = arith.constant 0 : index
    %137 = vector.load %arg6[%c2_133, %c2_134, %c0_135, %c0_136] : memref<3x3x4x4xbf16, #tpu.memory_space<vmem>>, vector<1x1x4x4xbf16>
    %138 = vector.shape_cast %137 : vector<1x1x4x4xbf16> to vector<4x4xbf16>
    %cst_137 = arith.constant dense<0.000000e+00> : vector<128x4xf32>
    %139 = tpu.matmul %136, %138, %cst_137 {dimension_numbers = #tpu.dot_dimension_numbers<[1], [0], [0], [1], [0, 0, 1, 1], [], []>} : vector<128x4xbf16>, vector<4x4xbf16>, vector<128x4xf32> -> vector<128x4xf32>
    %140 = arith.addf %134, %139 : vector<128x4xf32>
    %141 = vector.shape_cast %140 : vector<128x4xf32> to vector<8x16x4xf32>
    %c0_138 = arith.constant 0 : index
    %c0_139 = arith.constant 0 : index
    %c0_140 = arith.constant 0 : index
    %c0_141 = arith.constant 0 : index
    %142 = vector.load %arg2[%c0_138, %c0_139, %c0_140, %c0_141] : memref<1x8x16x4xf32, #tpu.memory_space<vmem>>, vector<1x8x16x4xf32>
    %143 = vector.shape_cast %142 : vector<1x8x16x4xf32> to vector<8x16x4xf32>
    %144 = arith.addf %143, %141 : vector<8x16x4xf32>
    %c0_142 = arith.constant 0 : index
    %c0_143 = arith.constant 0 : index
    %145 = vector.load %arg7[%c0_142, %c0_143] : memref<1x4xf32, #tpu.memory_space<vmem>>, vector<1x4xf32>
    %146 = vector.shape_cast %145 : vector<1x4xf32> to vector<1x1x4xf32>
    %147 = vector.broadcast %146 : vector<1x1x4xf32> to vector<8x16x4xf32>
    %148 = arith.addf %144, %147 : vector<8x16x4xf32>
    %cst_144 = arith.constant 0.000000e+00 : f32
    %149 = vector.broadcast %cst_144 : f32 to vector<8x16x4xf32>
    %150 = arith.maximumf %148, %149 : vector<8x16x4xf32>
    %c0_145 = arith.constant 0 : index
    %c0_146 = arith.constant 0 : index
    %c0_147 = arith.constant 0 : index
    %c0_148 = arith.constant 0 : index
    %151 = vector.load %arg8[%c0_145, %c0_146, %c0_147, %c0_148] : memref<1x8x16x4xf32, #tpu.memory_space<vmem>>, vector<1x8x16x4xf32>
    %152 = vector.shape_cast %151 : vector<1x8x16x4xf32> to vector<8x16x4xf32>
    %153 = vector.shape_cast %150 : vector<8x16x4xf32> to vector<1x8x16x4xf32>
    tpu.vector_store %arg8[%c0_145, %c0_146, %c0_147, %c0_148], %153 {strides = array<i32>} : memref<1x8x16x4xf32, #tpu.memory_space<vmem>>, vector<1x8x16x4xf32>,
    return
  }
  func.func @transform_0(%arg0: i32, %arg1: i32) -> (i32, i32, i32, i32) {
    %c0_i32 = arith.constant 0 : i32
    %c0_i32_0 = arith.constant 0 : i32
    %c0_i32_1 = arith.constant 0 : i32
    return %arg0, %arg1, %c0_i32, %c0_i32_0 : i32, i32, i32, i32
  }
  func.func @transform_1(%arg0: i32, %arg1: i32) -> (i32, i32, i32, i32, i32) {
    %c0_i32 = arith.constant 0 : i32
    %c0_i32_0 = arith.constant 0 : i32
    %c0_i32_1 = arith.constant 0 : i32
    %c0_i32_2 = arith.constant 0 : i32
    return %arg0, %arg1, %c0_i32, %c0_i32_0, %c0_i32_1 : i32, i32, i32, i32, i32
  }
  func.func @transform_2(%arg0: i32, %arg1: i32) -> (i32, i32, i32, i32) {
    %c0_i32 = arith.constant 0 : i32
    %c0_i32_0 = arith.constant 0 : i32
    %c0_i32_1 = arith.constant 0 : i32
    %c0_i32_2 = arith.constant 0 : i32
    %c0_i32_3 = arith.constant 0 : i32
    return %c0_i32, %c0_i32_0, %c0_i32_1, %c0_i32_2 : i32, i32, i32, i32
  }
  func.func @transform_3(%arg0: i32, %arg1: i32) -> (i32, i32) {
    %c0_i32 = arith.constant 0 : i32
    %c0_i32_0 = arith.constant 0 : i32
    %c0_i32_1 = arith.constant 0 : i32
    return %c0_i32, %c0_i32_0 : i32, i32
  }
  func.func @transform_4(%arg0: i32, %arg1: i32) -> (i32, i32, i32, i32) {
    %c0_i32 = arith.constant 0 : i32
    %c0_i32_0 = arith.constant 0 : i32
    %c0_i32_1 = arith.constant 0 : i32
    %c0_i32_2 = arith.constant 0 : i32
    %c0_i32_3 = arith.constant 0 : i32
    return %c0_i32, %c0_i32_0, %c0_i32_1, %c0_i32_2 : i32, i32, i32, i32
  }
  func.func @transform_5(%arg0: i32, %arg1: i32) -> (i32, i32) {
    %c0_i32 = arith.constant 0 : i32
    %c0_i32_0 = arith.constant 0 : i32
    %c0_i32_1 = arith.constant 0 : i32
    return %c0_i32, %c0_i32_0 : i32, i32
  }
  func.func @transform_6(%arg0: i32, %arg1: i32) -> (i32, i32, i32, i32) {
    %c0_i32 = arith.constant 0 : i32
    %c0_i32_0 = arith.constant 0 : i32
    %c0_i32_1 = arith.constant 0 : i32
    return %arg0, %arg1, %c0_i32, %c0_i32_0 : i32, i32, i32, i32
  }
}

</mosaic_0001>

<bundles_post_ra>
// kernel: resnet_block_forward_nhwc.1
= control target key start
LH: loop header
LB: loop body
LE: loop exit
PB: predicated region body
PF: predicated region fallthrough
CT: control target
= control target key end

     0   :  { %s4811_s21 = smov 0   ;;  %s4813_s22 = smov 0   ;;  %s5802_s0 = inlined_call_operand.vmem [shape: f32[2,16,16,4], index: 0, kind: input, shape index: {}]   ;;  %s5803_s1 = inlined_call_operand.vmem [shape: f32[2,2,4,16,4], index: 1, kind: input, shape index: {}]   ;;  %s5804_s2 = inlined_call_operand.vmem [shape: bf16[3,3,4,4], index: 2, kind: input, shape index: {}]   ;;  %s5805_s3 = inlined_call_operand.vmem [shape: f32[1,4], index: 3, kind: input, shape index: {}]   ;;  %s5806_s4 = inlined_call_operand.vmem [shape: bf16[3,3,4,4], index: 4, kind: input, shape index: {}]   ;;  %s5807_s5 = inlined_call_operand.vmem [shape: f32[1,4], index: 5, kind: input, shape index: {}]   ;;  %s5808_s6 = inlined_call_operand.vmem [shape: f32[2,16,16,4], index: 6, kind: output, shape index: {}]  }
   0x1   :  { %s4815_s23 = smov 0   ;;  %s4817_s24 = smov 0  }
   0x2   :  { %s4819_s25 = smov 0  }
   0x3 LB: > { %s25_s26 = sadd.s32 1, %s4766_s23  ;;  %s28_s27 = sadd.s32 1, %s4770_s24  ;;  %s4774_s25 = sphi %s4819_s25, %s16_s25   ;;  %s4770_s24 = sphi %s4817_s24, %s5812_s24   ;;  %s4766_s23 = sphi %s4815_s23, %s5811_s23   ;;  %s4762_s22 = sphi %s4813_s22, %s5810_s22   ;;  %s4758_s21 = sphi %s4811_s21, %s5809_s21  }
   0x4   : > { %p26_p0 = scmp.ge.s32.totalorder %s25_s26, 2  ;;  %p3650_p1 = scmp.ge.s32.totalorder %s4774_s25, 1 }
   0x5   : > { %p250_p2 = scmp.lt.s32.totalorder %s4774_s25, 5 }
   0x6   : > { %s5814_s26 = smov (%p26_p0, %s25_s26), 0  ;;  %s5816_s27 = smov (!%p26_p0, %s28_s27), %s4770_s24 }
   0x7   : > { %p251_p3 = pnand %p3650_p1, %p250_p2  ;;  %p30_p4 = scmp.ge.s32.totalorder %s5816_s27, 2 }
   0x8   : > { %v492_v0 = vld [vmem:[%s5804_s2] sm:$0x3] (!%p251_p3)  ;;  %vm646_vm0 = vcmask (!%p251_p3), 1041408   ;;  %s3651_s30 = sshll.u32 (!%p251_p3), %s4758_s21, 3  ;;  %p300_p5 = scmp.lt.s32.totalorder (!%p251_p3), %s4762_s22, 1  ;;  %vm348_vm1 = vcmask (!%p251_p3), 31744  }
   0x9   : > { %s5818_s27 = smov (%p30_p4, %s5816_s27), 0  ;;  %254 = sbr.rel (%p251_p3) target bundleno = 1109 (0x455), region = 44 }
   0xa   : > { %4679 = vmatprep.subr.msk.bf16.mxu0 (!%p251_p3), %vm646_vm0, %v492_v0  ;;  %v784_v1 = vsel (!%p251_p3), %vm646_vm0, %v492_v0, 0  ;;  %p302_p6 = scmp.lt.s32.totalorder (!%p251_p3), %s3651_s30, 15  ;;  %v4852_v2 = vld [vmem:[%s5804_s2 + $0x4] sm:$0x3] (!%p251_p3)  ;;  %p312_p7 = scmp.lt.s32.totalorder (!%p251_p3), %s4758_s21, 1  ;;  %vm395_vm2 = vcmask (!%p251_p3), 24576  }
   0xb   : > { %4053 = vmatpush3.bf16.msra.mxu0 (!%p251_p3), %v784_v1  ;;  %v983_v55 = vsel (!%p251_p3), %vm646_vm0, %v4852_v2, 0  ;;  %v3698_v56 = vld [vmem:[%s5804_s2 + $0x6] sm:$0x3] (!%p251_p3)  ;;  %vm919_vm3 = vcmask (!%p251_p3), 1046528   ;;  %vm493_vm4 = vsmask.f32 (!%p251_p3), 7424 }
   0xc   : > { %4680 = vmatprep.subr.msk.bf16.mxu0 (!%p251_p3), %vm646_vm0, %v4852_v2  ;;  %vm2063_vm5 = vcmask (!%p251_p3), 25601   ;;  %vm2074_vm6 = vcmask (!%p251_p3), 30726   ;;  %p3765_p8 = scmp.ne.s32.totalorder (!%p251_p3), %s4758_s21, 0 }
  0x10   : > { %s5820_s22 = smov (!%p300_p5, %s4762_s22), 1  ;;  %s5822_s30 = smov (!%p302_p6, %s3651_s30), 15 }
  0x11   : > { %s3653_s9 = sshll.u32 %s5820_s22, 5  ;;  %s3652_s10 = sshll.u32 %s5822_s30, 1  ;;  %vm2095_vm7 = vcmask (!%p3765_p8), 25600  }
  0x12   : > { %s306_s11 = sadd.s32 %s3653_s9, %s3652_s10  ;;  %s3656_s13 = sshll.u32 %s5820_s22, 4 }
  0x13   : > { %s3654_s12 = sshll.u32 %s306_s11, 3 }
  0x14   : > { %s4864_s16 = scalar_lea.vmem %s5802_s0, %s3654_s12  ;;  %s4869_s19 = scalar_lea.vmem %s5808_s6, %s3654_s12 }
  0x15   : > { %s313_s20 = scalar_select %p312_p7, %s4758_s21, 1  ;;  %v331_v3 = vld [vmem:[%s4864_s16] sm:$0xff]  ;;  %v332_v4 = vld [vmem:[%s4864_s16 + $0x8] sm:$0xff]  ;;  %v333_v5 = vld [vmem:[%s4864_s16 + $0x10] sm:$0xff] }
  0x16   : > { %349 = vst.msk [vmem:[#allocation2 + $0x31] sm:$0xff] %vm348_vm1, %v331_v3  ;;  %350 = vst.msk [vmem:[#allocation2 + $0x39] sm:$0xff] %vm348_vm1, %v332_v4  ;;  %v334_v6 = vld [vmem:[%s4864_s16 + $0x18] sm:$0xff]  ;;  %v335_v7 = vld [vmem:[%s4864_s16 + $0x20] sm:$0xff] }
  0x17   : > { %351 = vst.msk [vmem:[#allocation2 + $0x49] sm:$0xff] %vm348_vm1, %v333_v5  ;;  %v336_v8 = vld [vmem:[%s4864_s16 + $0x28] sm:$0xff]  ;;  %s3655_s22 = sshll.u32 %s313_s20, 3  ;;  %352 = vst.msk [vmem:[#allocation2 + $0x51] sm:$0xff] %vm348_vm1, %v334_v6  ;;  %v337_v9 = vld [vmem:[%s4864_s16 + $0x30] sm:$0xff] }
  0x18   : > { %353 = vst.msk [vmem:[#allocation2 + $0x61] sm:$0xff] %vm348_vm1, %v335_v7  ;;  %354 = vst.msk [vmem:[#allocation2 + $0x69] sm:$0xff] %vm348_vm1, %v336_v8  ;;  %v338_v10 = vld [vmem:[%s4864_s16 + $0x38] sm:$0xff]  ;;  %v339_v11 = vld [vmem:[%s4864_s16 + $0x40] sm:$0xff]  ;;  %s316_s28 = sadd.s32 %s3656_s13, %s3655_s22 }
  0x19   : > { %355 = vst.msk [vmem:[#allocation2 + $0x79] sm:$0xff] %vm348_vm1, %v337_v9  ;;  %356 = vst.msk [vmem:[#allocation2 + $0x81] sm:$0xff] %vm348_vm1, %v338_v10  ;;  %v340_v12 = vld [vmem:[%s4864_s16 + $0x48] sm:$0xff]  ;;  %v341_v13 = vld [vmem:[%s4864_s16 + $0x50] sm:$0xff]  ;;  %s3657_s29 = sshll.u32 %s316_s28, 3 }
  0x1a   : > { %357 = vst.msk [vmem:[#allocation2 + $0x91] sm:$0xff] %vm348_vm1, %v339_v11  ;;  %v342_v14 = vld [vmem:[%s4864_s16 + $0x58] sm:$0xff]  ;;  %358 = vst.msk [vmem:[#allocation2 + $0x99] sm:$0xff] %vm348_vm1, %v340_v12  ;;  %v343_v15 = vld [vmem:[%s4864_s16 + $0x60] sm:$0xff]  ;;  %s4902_s8 = scalar_lea.vmem %s5803_s1, %s3657_s29 }
  0x1b   : > { %359 = vst.msk [vmem:[#allocation2 + $0xa9] sm:$0xff] %vm348_vm1, %v341_v13  ;;  %360 = vst.msk [vmem:[#allocation2 + $0xb1] sm:$0xff] %vm348_vm1, %v342_v14  ;;  %v344_v16 = vld [vmem:[%s4864_s16 + $0x68] sm:$0xff]  ;;  %v345_v17 = vld [vmem:[%s4864_s16 + $0x70] sm:$0xff] }
  0x1c   : > { %361 = vst.msk [vmem:[#allocation2 + $0xc1] sm:$0xff] %vm348_vm1, %v343_v15  ;;  %362 = vst.msk [vmem:[#allocation2 + $0xc9] sm:$0xff] %vm348_vm1, %v344_v16  ;;  %v346_v18 = vld [vmem:[%s4864_s16 + $0x78] sm:$0xff]  ;;  %v365_v19 = vld [vmem:[%s4902_s8] sm:$0xff] }
  0x1d   : > { %363 = vst.msk [vmem:[#allocation2 + $0xd9] sm:$0xff] %vm348_vm1, %v345_v17  ;;  %v366_v20 = vld [vmem:[%s4902_s8 + $0x8] sm:$0xff]  ;;  %v367_v21 = vld [vmem:[%s4902_s8 + $0x10] sm:$0xff]  ;;  %364 = vst.msk [vmem:[#allocation2 + $0xe1] sm:$0xff] %vm348_vm1, %v346_v18 }
  0x1e   : > { %369 = vst.msk [vmem:[#allocation2 + $0x1] sm:$0xff] %vm348_vm1, %v365_v19  ;;  %370 = vst.msk [vmem:[#allocation2 + $0x9] sm:$0xff] %vm348_vm1, %v366_v20  ;;  %v368_v22 = vld [vmem:[%s4902_s8 + $0x18] sm:$0xff]  ;;  %v3662_v23 = vld [vmem:[%s4902_s8 + $0x20] sm:$0xff] }
  0x1f   : > { %371 = vst.msk [vmem:[#allocation2 + $0x19] sm:$0xff] %vm348_vm1, %v367_v21  ;;  %v3663_v24 = vld [vmem:[%s4902_s8 + $0x28] sm:$0xff]  ;;  %372 = vst.msk [vmem:[#allocation2 + $0x21] sm:$0xff] %vm348_vm1, %v368_v22  ;;  %v385_v25 = vld [vmem:[#allocation2 + $0x32] sm:$0x1] }
  0x20   : > { %v386_v26 = vld [vmem:[#allocation2 + $0x4a] sm:$0x1]  ;;  %379 = vst.msk [vmem:[#allocation2 + $0xf1] sm:$0xff] %vm348_vm1, %v3662_v23  ;;  %380 = vst.msk [vmem:[#allocation2 + $0xf9] sm:$0xff] %vm348_vm1, %v3663_v24  ;;  %v387_v27 = vld [vmem:[#allocation2 + $0x62] sm:$0x1] }
  0x21   : > { %398 = vst.msk [vmem:[#allocation2 + $0x30] sm:$0x1] %vm395_vm2, %v385_v25  ;;  %399 = vst.msk [vmem:[#allocation2 + $0x48] sm:$0x1] %vm395_vm2, %v386_v26  ;;  %v388_v28 = vld [vmem:[#allocation2 + $0x7a] sm:$0x1] }
  0x22   : > { %400 = vst.msk [vmem:[#allocation2 + $0x60] sm:$0x1] %vm395_vm2, %v387_v27  ;;  %v389_v29 = vld [vmem:[#allocation2 + $0x92] sm:$0x1]  ;;  %401 = vst.msk [vmem:[#allocation2 + $0x78] sm:$0x1] %vm395_vm2, %v388_v28 }
  0x23   : > { %402 = vst.msk [vmem:[#allocation2 + $0x90] sm:$0x1] %vm395_vm2, %v389_v29  ;;  %v390_v30 = vld [vmem:[#allocation2 + $0xaa] sm:$0x1]  ;;  %v391_v31 = vld [vmem:[#allocation2 + $0xc2] sm:$0x1] }
  0x24   : > { %403 = vst.msk [vmem:[#allocation2 + $0xa8] sm:$0x1] %vm395_vm2, %v390_v30  ;;  %v392_v32 = vld [vmem:[#allocation2 + $0xda] sm:$0x1]  ;;  %404 = vst.msk [vmem:[#allocation2 + $0xc0] sm:$0x1] %vm395_vm2, %v391_v31 }
  0x25   : > { %405 = vst.msk [vmem:[#allocation2 + $0xd8] sm:$0x1] %vm395_vm2, %v392_v32  ;;  %v410_v33 = vld [vmem:[#allocation2 + $0x3f] sm:$0x1]  ;;  %v411_v34 = vld [vmem:[#allocation2 + $0x57] sm:$0x1] }
  0x26   : > { %v383_v35 = vld [vmem:[#allocation2 + $0x2] sm:$0x1]  ;;  %v384_v36 = vld [vmem:[#allocation2 + $0x1a] sm:$0x1]  ;;  %422 = vst.msk [vmem:[#allocation2 + $0x41] sm:$0x1] %vm395_vm2, %v410_v33 }
  0x27   : > { %423 = vst.msk [vmem:[#allocation2 + $0x59] sm:$0x1] %vm395_vm2, %v411_v34  ;;  %396 = vst.msk [vmem:[#allocation2] sm:$0x1] %vm395_vm2, %v383_v35  ;;  %v408_v37 = vld [vmem:[#allocation2 + $0xf] sm:$0x1] }
  0x28   : > { %397 = vst.msk [vmem:[#allocation2 + $0x18] sm:$0x1] %vm395_vm2, %v384_v36  ;;  %v409_v38 = vld [vmem:[#allocation2 + $0x27] sm:$0x1]  ;;  %420 = vst.msk [vmem:[#allocation2 + $0x11] sm:$0x1] %vm395_vm2, %v408_v37 }
  0x29   : > { %421 = vst.msk [vmem:[#allocation2 + $0x29] sm:$0x1] %vm395_vm2, %v409_v38  ;;  %v412_v39 = vld [vmem:[#allocation2 + $0x6f] sm:$0x1]  ;;  %v413_v40 = vld [vmem:[#allocation2 + $0x87] sm:$0x1] }
  0x2a   : > { %424 = vst.msk [vmem:[#allocation2 + $0x71] sm:$0x1] %vm395_vm2, %v412_v39  ;;  %v414_v41 = vld [vmem:[#allocation2 + $0x9f] sm:$0x1]  ;;  %425 = vst.msk [vmem:[#allocation2 + $0x89] sm:$0x1] %vm395_vm2, %v413_v40 }
  0x2b   : > { %426 = vst.msk [vmem:[#allocation2 + $0xa1] sm:$0x1] %vm395_vm2, %v414_v41  ;;  %v415_v42 = vld [vmem:[#allocation2 + $0xb7] sm:$0x1]  ;;  %v433_v43 = vld [vmem:[#allocation2 + $0x8] sm:$0xff]  ;;  %v439_v44 = vld [vmem:[#allocation2 + $0x38] sm:$0xff] }
  0x2c   : > { %427 = vst.msk [vmem:[#allocation2 + $0xb9] sm:$0x1] %vm395_vm2, %v415_v42  ;;  %v416_v45 = vld [vmem:[#allocation2 + $0xcf] sm:$0x1]  ;;  %v436_v46 = vld [vmem:[#allocation2 + $0x20] sm:$0xff]  ;;  %v438_v47 = vld [vmem:[#allocation2 + $0x30] sm:$0xff] }
  0x2d   : > { %428 = vst.msk [vmem:[#allocation2 + $0xd1] sm:$0x1] %vm395_vm2, %v416_v45  ;;  %v417_v48 = vld [vmem:[#allocation2 + $0xe7] sm:$0x1]  ;;  %v393_v51 = vld [vmem:[#allocation2 + $0xf2] sm:$0x1]  ;;  %v4945_v54 = vpack.c.bf16 %v439_v44, %v438_v47 }
  0x2e   : > { %429 = vst.msk [vmem:[#allocation2 + $0xe9] sm:$0x1] %vm395_vm2, %v417_v48  ;;  %v432_v49 = vld [vmem:[#allocation2] sm:$0xff]  ;;  %406 = vst.msk [vmem:[#allocation2 + $0xf0] sm:$0x1] %vm395_vm2, %v393_v51  ;;  %v441_v57 = vld [vmem:[#allocation2 + $0x48] sm:$0xff] }
  0x2f   : > { %v435_v50 = vld [vmem:[#allocation2 + $0x18] sm:$0xff]  ;;  %v4941_v52 = vpack.c.bf16 %v433_v43, %v432_v49  ;;  %v442_v58 = vld [vmem:[#allocation2 + $0x50] sm:$0xff]  ;;  %v444_v59 = vld [vmem:[#allocation2 + $0x60] sm:$0xff]  ;;  %v926_v26 = vrot.slane %v4945_v54, 1  ;;  %v1124_v32 = vsel %vm646_vm0, %v3698_v56, 0 }
  0x30   : > { %v4943_v53 = vpack.c.bf16 %v436_v46, %v435_v50  ;;  %v445_v60 = vld [vmem:[#allocation2 + $0x68] sm:$0xff]  ;;  %v4960_v61 = vpack.c.bf16 %v442_v58, %v441_v57  ;;  %v418_v63 = vld [vmem:[#allocation2 + $0xff] sm:$0x1]  ;;  %v448_v1 = vld [vmem:[#allocation2 + $0x80] sm:$0xff] }
  0x31   : > { %4054 = vmatprep.mubr.msk.bf16.mxu0 %vm348_vm1, %v4941_v52  ;;  %v4962_v62 = vpack.c.bf16 %v445_v60, %v444_v59  ;;  %v447_v0 = vld [vmem:[#allocation2 + $0x78] sm:$0xff]  ;;  %430 = vst.msk [vmem:[#allocation2 + $0x101] sm:$0x1] %vm395_vm2, %v418_v63  ;;  %v450_v2 = vld [vmem:[#allocation2 + $0x90] sm:$0xff]  ;;  %v453_v6 = vld [vmem:[#allocation2 + $0xa8] sm:$0xff]  ;;  %v920_v16 = vrot.slane %v4941_v52, 1 }
  0x32   : > { %4055 = vmatmul.mubr.msk.bf16.vlgmr.msra.gmra.mrb[0].mxu0 %vm348_vm1, %v4943_v53  ;;  %v451_v3 = vld [vmem:[#allocation2 + $0x98] sm:$0xff]  ;;  %v4969_v4 = vpack.c.bf16 %v448_v1, %v447_v0  ;;  %v454_v7 = vld [vmem:[#allocation2 + $0xb0] sm:$0xff]  ;;  %v456_v8 = vld [vmem:[#allocation2 + $0xc0] sm:$0xff]  ;;  %v923_v24 = vrot.slane %v4943_v53, 1  ;;  %v929_v36 = vrot.slane %v4960_v61, 1 }
  0x33   : > { %4075 = vmatpush3.bf16.msra.mxu0 %v983_v55  ;;  %4058 = vmatprep.mubr.msk.bf16.mxu0 %vm348_vm1, %v4945_v54  ;;  %v4971_v5 = vpack.c.bf16 %v451_v3, %v450_v2  ;;  %v457_v9 = vld [vmem:[#allocation2 + $0xc8] sm:$0xff]  ;;  %v434_v10 = vld [vmem:[#allocation2 + $0x10] sm:$0x3]  ;;  %v4977_v11 = vpack.c.bf16 %v454_v7, %v453_v6  ;;  %v459_v14 = vld [vmem:[#allocation2 + $0xd8] sm:$0xff]  ;;  %v932_v38 = vrot.slane %v4962_v62, 1 }
  0x34   : > { %4681 = vmatprep.subr.msk.bf16.mxu0 %vm646_vm0, %v3698_v56  ;;  %v4979_v12 = vpack.c.bf16 %v457_v9, %v456_v8  ;;  %v4981_v13 = vpack.c.bf16 %v434_v10, %v434_v10  ;;  %v460_v15 = vld [vmem:[#allocation2 + $0xe0] sm:$0xff]  ;;  %v437_v18 = vld [vmem:[#allocation2 + $0x28] sm:$0x3]  ;;  %v443_v28 = vld [vmem:[#allocation2 + $0x58] sm:$0x3]  ;;  %v935_v46 = vrot.slane %v4969_v4, 1 }
  0x35   : > { %v440_v19 = vld [vmem:[#allocation2 + $0x40] sm:$0x3]  ;;  %v4989_v20 = vpack.c.bf16 %v460_v15, %v459_v14  ;;  %v4991_v21 = vpack.c.bf16 %v437_v18, %v437_v18  ;;  %v446_v29 = vld [vmem:[#allocation2 + $0x70] sm:$0x3]  ;;  %v5006_v31 = vpack.c.bf16 %v443_v28, %v443_v28  ;;  %v3709_v35 = vld [vmem:[%s5804_s2 + $0x8] sm:$0x3] }
  0x36   : > { %v921_v17 = vrot.slane %v4981_v13, 1  ;;  %v4994_v23 = vpack.c.bf16 %v440_v19, %v440_v19  ;;  %v5012_v34 = vpack.c.bf16 %v446_v29, %v446_v29  ;;  %v449_v40 = vld [vmem:[#allocation2 + $0x88] sm:$0x3]  ;;  %v452_v41 = vld [vmem:[#allocation2 + $0xa0] sm:$0x3]  ;;  %v938_v48 = vrot.slane %v4971_v5, 1 }
  0x37   : > { %v924_v25 = vrot.slane %v4991_v21, 1  ;;  %v930_v37 = vrot.slane %v5006_v31, 1  ;;  %v5029_v43 = vpack.c.bf16 %v449_v40, %v449_v40  ;;  %v5034_v45 = vpack.c.bf16 %v452_v41, %v452_v41  ;;  %v455_v50 = vld [vmem:[#allocation2 + $0xb8] sm:$0x3]  ;;  %v458_v51 = vld [vmem:[#allocation2 + $0xd0] sm:$0x3] }
  0x38   : > { %v922_v22 = vsel %vm919_vm3, %v920_v16, %v921_v17  ;;  %v927_v27 = vrot.slane %v4994_v23, 1  ;;  %v933_v39 = vrot.slane %v5012_v34, 1  ;;  %v5047_v56 = vpack.c.bf16 %v455_v50, %v455_v50  ;;  %v461_v1 = vld [vmem:[#allocation2 + $0xe8] sm:$0x3]  ;;  %v3720_v14 = vld [vmem:[%s5804_s2 + $0xa] sm:$0x3] }
  0x39   : > { %v5004_v30 = vsel %vm919_vm3, %v923_v24, %v924_v25  ;;  %v5027_v42 = vsel %vm919_vm3, %v929_v36, %v930_v37  ;;  %v936_v47 = vrot.slane %v5029_v43, 1  ;;  %v939_v49 = vrot.slane %v5034_v45, 1  ;;  %v3664_v15 = vld [vmem:[%s4902_s8 + $0x30] sm:$0xff]  ;;  %v3665_v16 = vld [vmem:[%s4902_s8 + $0x38] sm:$0xff] }
  0x3a   : > { %4059 = vmatmul.mubr.msk.bf16.gmra.mrb[4].mxu0 %vm348_vm1, %v4960_v61  ;;  %v5010_v33 = vsel %vm919_vm3, %v926_v26, %v927_v27  ;;  %v5032_v44 = vsel %vm919_vm3, %v932_v38, %v933_v39  ;;  %v5052_v58 = vpack.c.bf16 %v458_v51, %v458_v51  ;;  %v941_v59 = vrot.slane %v4977_v11, 1  ;;  %381 = vst.msk [vmem:[#allocation2 + $0x109] sm:$0xff] %vm348_vm1, %v3664_v15  ;;  %v462_v25 = vld [vmem:[#allocation2 + $0xf0] sm:$0xff]  ;;  %v463_v26 = vld [vmem:[#allocation2 + $0xf8] sm:$0xff] }
  0x3b   : > { %4062 = vmatprep.mubr.msk.bf16.mxu0 %vm348_vm1, %v4962_v62  ;;  %v5045_v55 = vsel %vm919_vm3, %v935_v46, %v936_v47  ;;  %v5050_v57 = vsel %vm919_vm3, %v938_v48, %v939_v49  ;;  %v942_v60 = vrot.slane %v5047_v56, 1  ;;  %v944_v63 = vrot.slane %v4979_v12, 1  ;;  %382 = vst.msk [vmem:[#allocation2 + $0x111] sm:$0xff] %vm348_vm1, %v3665_v16 }
  0x3c   : > { %v945_v0 = vrot.slane %v5052_v58, 1  ;;  %v5065_v3 = vpack.c.bf16 %v461_v1, %v461_v1  ;;  %v947_v7 = vrot.slane %v4989_v20, 1  ;;  %v1276_v10 = vsel %vm646_vm0, %v3709_v35, 0 }
  0x3d   : > { %v5063_v2 = vsel %vm919_vm3, %v941_v59, %v942_v60  ;;  %v509_v18 = vshll.u32 %v4943_v53, 16  ;;  %v507_v19 = vshrl.u32 %v4943_v53, 16  ;;  %v514_v24 = vshll.u32 %v4991_v21, 16 }
  0x3e   : > { %v5068_v6 = vsel %vm919_vm3, %v944_v63, %v945_v0  ;;  %v948_v8 = vrot.slane %v5065_v3, 1  ;;  %v521_v27 = vshll.u32 %v4945_v54, 16  ;;  %v519_v21 = vshrl.u32 %v4945_v54, 16 }
  0x3f   : > { %v516_v29 = vrot.slane %v514_v24, 1  ;;  %v531_v38 = vshrl.u32 %v4960_v61, 16  ;;  %v538_v40 = vshll.u32 %v5006_v31, 16  ;;  %v557_v49 = vshll.u32 %v4969_v4, 16 }
  0x40   : > { %v5077_v9 = vsel %vm919_vm3, %v947_v7, %v948_v8  ;;  %v523_v36 = vrot.slane %v521_v27, 1  ;;  %v1422_v50 = vsel %vm646_vm0, %v3720_v14, 0  ;;  %v543_v31 = vshrl.u32 %v4962_v62, 16  ;;  %v5143_v8 = vld [vmem:[%s5804_s2 + $0xc] sm:$0x3] }
  0x41   : > { %v394_v17 = vld [vmem:[#allocation2 + $0x10a] sm:$0x1]  ;;  %v540_v48 = vrot.slane %v538_v40, 1  ;;  %v550_v60 = vshll.u32 %v5012_v34, 16  ;;  %v555_v0 = vshrl.u32 %v4969_v4, 16  ;;  %v559_v1 = vrot.slane %v557_v49, 1 }
  0x42   : > { %4063 = vmatmul.mubr.msk.bf16.gmra.mrb[8].mxu0 %vm348_vm1, %v4969_v4  ;;  %407 = vst.msk [vmem:[#allocation2 + $0x108] sm:$0x1] %vm395_vm2, %v394_v17  ;;  %v524_v46 = vor.u32 %v523_v36, %v519_v21  ;;  %v562_v7 = vshll.u32 %v5029_v43, 16  ;;  %v581_v43 = vshll.u32 %v4977_v11, 16  ;;  %v586_v27 = vshll.u32 %v5047_v56, 16 }
  0x43   : > { %4066 = vmatprep.mubr.msk.bf16.mxu0 %vm348_vm1, %v4971_v5  ;;  %v560_v15 = vor.u32 %v559_v1, %v555_v0  ;;  %v605_v36 = vshll.u32 %v4989_v20, 16  ;;  %v591_v56 = vshrl.u32 %v4979_v12, 16  ;;  %v598_v40 = vshll.u32 %v5052_v58, 16 }
  0x44   : > { %v564_v16 = vrot.slane %v562_v7, 1  ;;  %v588_v21 = vrot.slane %v586_v27, 1  ;;  %v1563_v27 = vsel %vm646_vm0, %v5143_v8, 0 }
  0x46   : > { %v5159_v24 = vsel %vm493_vm4, %v560_v15, %v564_v16  ;;  %v502_v16 = vshll.u32 %v4981_v13, 16 }
  0x4a   : > { %4067 = vmatmul.mubr.msk.bf16.gmra.mrb[12].mxu0 %vm348_vm1, %v4977_v11 }
  0x4b   : > { %4070 = vmatprep.mubr.msk.bf16.mxu0 %vm348_vm1, %v4979_v12 }
  0x52   : > { %4071 = vmatmul.mubr.msk.bf16.gmra.mrb[16].mxu0 %vm348_vm1, %v4989_v20 }
  0x53   : > { %4076 = vmatprep.mubr.msk.bf16.mxu0 %vm348_vm1, %v922_v22  ;;  %v511_v22 = vrot.slane %v509_v18, 1  ;;  %v567_v18 = vshrl.u32 %v4971_v5, 16 }
  0x55   : > { %v512_v28 = vor.u32 %v511_v22, %v507_v19  ;;  %v574_v22 = vshll.u32 %v5034_v45, 16 }
  0x57   : > { %v5119_v37 = vsel %vm493_vm4, %v512_v28, %v516_v29  ;;  %v419_v28 = vld [vmem:[#allocation2 + $0x117] sm:$0x1] }
  0x58   : > { %431 = vst.msk [vmem:[#allocation2 + $0x119] sm:$0x1] %vm395_vm2, %v419_v28 }
  0x5a   : > { %4077 = vmatmul.mubr.msk.bf16.vlgmr.msra.gmra.mrb[0].mxu0 %vm348_vm1, %v5004_v30 }
  0x5b   : > { %4097 = vmatpush3.bf16.msra.mxu0 %v1124_v32  ;;  %4080 = vmatprep.mubr.msk.bf16.mxu0 %vm348_vm1, %v5010_v33  ;;  %v533_v32 = vshll.u32 %v4960_v61, 16 }
  0x5c   : > { %4682 = vmatprep.subr.msk.bf16.mxu0 %vm646_vm0, %v3709_v35  ;;  %v5114_v35 = vpack.c.bf16 %v463_v26, %v462_v25  ;;  %v579_v25 = vshrl.u32 %v4977_v11, 16  ;;  %v583_v26 = vrot.slane %v581_v43, 1 }
  0x5d   : > { %v535_v39 = vrot.slane %v533_v32, 1  ;;  %v576_v32 = vrot.slane %v574_v22, 1 }
  0x5e   : > { %v584_v45 = vor.u32 %v583_v26, %v579_v25  ;;  %v1261_v58 = vshll.u32 %v5114_v35, 16  ;;  %v1259_v7 = vshrl.u32 %v5114_v35, 16  ;;  %v504_v25 = vrot.slane %v502_v16, 1 }
  0x5f   : > { %v536_v47 = vor.u32 %v535_v39, %v531_v38 }
  0x61   : > { %v5136_v63 = vsel %vm493_vm4, %v536_v47, %v540_v48  ;;  %v607_v47 = vrot.slane %v605_v36, 1  ;;  %v610_v48 = vshll.u32 %v5065_v3, 16  ;;  %v1263_v3 = vrot.slane %v1261_v58, 1  ;;  %v5341_v58 = vld [vmem:[%s5805_s3] ss:$0 sm:$0xff] }
  0x62   : > { %4081 = vmatmul.mubr.msk.bf16.gmra.mrb[4].mxu0 %vm348_vm1, %v5027_v42 }
  0x63   : > { %4084 = vmatprep.mubr.msk.bf16.mxu0 %vm348_vm1, %v5032_v44 }
  0x6a   : > { %4085 = vmatmul.mubr.msk.bf16.gmra.mrb[8].mxu0 %vm348_vm1, %v5045_v55 }
  0x6b   : > { %4088 = vmatprep.mubr.msk.bf16.mxu0 %vm348_vm1, %v5050_v57 }
  0x72   : > { %4089 = vmatmul.mubr.msk.bf16.gmra.mrb[12].mxu0 %vm348_vm1, %v5063_v2 }
  0x73   : > { %4092 = vmatprep.mubr.msk.bf16.mxu0 %vm348_vm1, %v5068_v6 }
  0x7a   : > { %4093 = vmatmul.mubr.msk.bf16.gmra.mrb[16].mxu0 %vm348_vm1, %v5077_v9 }
  0x7b   : > { %4098 = vmatprep.mubr.msk.bf16.mxu0 %vm348_vm1, %v4943_v53  ;;  %v526_v53 = vshll.u32 %v4994_v23, 16  ;;  %v545_v23 = vshll.u32 %v4962_v62, 16 }
  0x7d   : > { %v528_v41 = vrot.slane %v526_v53, 1  ;;  %v547_v59 = vrot.slane %v545_v23, 1  ;;  %v593_v53 = vshll.u32 %v4979_v12, 16  ;;  %v603_v23 = vshrl.u32 %v4989_v20, 16 }
  0x7f   : > { %v5131_v51 = vsel %vm493_vm4, %v524_v46, %v528_v41  ;;  %v548_v34 = vor.u32 %v547_v59, %v543_v31  ;;  %v595_v39 = vrot.slane %v593_v53, 1  ;;  %v464_v41 = vld [vmem:[#allocation2 + $0x100] sm:$0x3]  ;;  %v5176_v46 = vsel %vm493_vm4, %v584_v45, %v588_v21 }
  0x80   : > { %v489_v49 = vpack.c.bf16 %v464_v41, %v464_v41  ;;  %v600_v31 = vrot.slane %v598_v40, 1  ;;  %v608_v59 = vor.u32 %v607_v47, %v603_v23 }
  0x82   : > { %4099 = vmatmul.mubr.msk.bf16.vlgmr.msra.gmra.mrb[0].mxu0 %vm348_vm1, %v4945_v54  ;;  %v1266_v0 = vshll.u32 %v489_v49, 16 }
  0x83   : > { %4119 = vmatpush3.bf16.msra.mxu0 %v1276_v10  ;;  %4102 = vmatprep.mubr.msk.bf16.mxu0 %vm348_vm1, %v4960_v61  ;;  %v552_v10 = vrot.slane %v550_v60, 1  ;;  %v612_v60 = vrot.slane %v610_v48, 1 }
  0x84   : > { %4683 = vmatprep.subr.msk.bf16.mxu0 %vm646_vm0, %v3720_v14  ;;  %v569_v14 = vshll.u32 %v4971_v5, 16  ;;  %v1268_v43 = vrot.slane %v1266_v0, 1 }
  0x85   : > { %v5154_v17 = vsel %vm493_vm4, %v548_v34, %v552_v10  ;;  %v497_v34 = vshll.u32 %v4941_v52, 16  ;;  %v5191_v10 = vsel %vm493_vm4, %v608_v59, %v612_v60 }
  0x86   : > { %v571_v19 = vrot.slane %v569_v14, 1  ;;  %v495_v14 = vshrl.u32 %v4941_v52, 16 }
  0x87   : > { %v499_v15 = vrot.slane %v497_v34, 1 }
  0x88   : > { %v572_v29 = vor.u32 %v571_v19, %v567_v18  ;;  %v3666_v18 = vld [vmem:[%s5804_s2 + $0x2] sm:$0x3]  ;;  %v1264_v19 = vor.u32 %v1263_v3, %v1259_v7 }
  0x89   : > { %4678 = vmatprep.subr.msk.bf16.mxu1 %vm646_vm0, %v3666_v18  ;;  %v648_v22 = vsel %vm646_vm0, %v3666_v18, 0  ;;  %v500_v52 = vor.u32 %v499_v15, %v495_v14 }
  0x8a   : > { %4103 = vmatmul.mubr.msk.bf16.gmra.mrb[4].mxu0 %vm348_vm1, %v4962_v62  ;;  %v5171_v38 = vsel %vm493_vm4, %v572_v29, %v576_v32  ;;  %4031 = vmatpush3.bf16.msra.mxu1 %v648_v22  ;;  %v1269_v26 = vsel %vm493_vm4, %v1264_v19, %v1268_v43  ;;  %v3753_v32 = vld [vmem:[%s5804_s2 + $0x10] sm:$0x3] }
  0x8b   : > { %4106 = vmatprep.mubr.msk.bf16.mxu0 %vm348_vm1, %v4969_v4  ;;  %v505_v13 = vsel %vm493_vm4, %v500_v52, %v504_v25 }
  0x8c   : > { %4032 = vmatprep.mubr.msk.bf16.mxu1 %vm348_vm1, %v505_v13 }
  0x8d   : > { %4033 = vmatmul.mubr.msk.bf16.vlgmr.msra.gmra.mrb[0].mxu1 %vm348_vm1, %v5119_v37 }
  0x8e   : > { %4036 = vmatprep.mubr.msk.bf16.mxu1 %vm348_vm1, %v5131_v51 }
  0x92   : > { %4107 = vmatmul.mubr.msk.bf16.gmra.mrb[8].mxu0 %vm348_vm1, %v4971_v5 }
  0x93   : > { %4110 = vmatprep.mubr.msk.bf16.mxu0 %vm348_vm1, %v4977_v11 }
  0x95   : > { %4037 = vmatmul.mubr.msk.bf16.gmra.mrb[4].mxu1 %vm348_vm1, %v5136_v63 }
  0x96   : > { %4040 = vmatprep.mubr.msk.bf16.mxu1 %vm348_vm1, %v5154_v17 }
  0x9a   : > { %4111 = vmatmul.mubr.msk.bf16.gmra.mrb[12].mxu0 %vm348_vm1, %v4979_v12 }
  0x9b   : > { %4114 = vmatprep.mubr.msk.bf16.mxu0 %vm348_vm1, %v4989_v20 }
  0x9d   : > { %4041 = vmatmul.mubr.msk.bf16.gmra.mrb[8].mxu1 %vm348_vm1, %v5159_v24 }
  0x9e   : > { %4044 = vmatprep.mubr.msk.bf16.mxu1 %vm348_vm1, %v5171_v38 }
  0xa2   : > { %4115 = vmatmul.mubr.msk.bf16.gmra.mrb[16].mxu0 %vm348_vm1, %v5114_v35 }
  0xa3   : > { %4120 = vmatprep.mubr.msk.bf16.mxu0 %vm348_vm1, %v5119_v37  ;;  %v3742_v37 = vld [vmem:[%s5804_s2 + $0xe] sm:$0x3] }
  0xa4   : > { %v1715_v29 = vsel %vm646_vm0, %v3742_v37, 0 }
  0xa5   : > { %4045 = vmatmul.mubr.msk.bf16.gmra.mrb[12].mxu1 %vm348_vm1, %v5176_v46 }
  0xaa   : > { %4121 = vmatmul.mubr.msk.bf16.vlgmr.msra.gmra.mrb[0].mxu0 %vm348_vm1, %v5131_v51 }
  0xab   : > { %4141 = vmatpush3.bf16.msra.mxu0 %v1422_v50  ;;  %4124 = vmatprep.mubr.msk.bf16.mxu0 %vm348_vm1, %v5136_v63  ;;  %v596_v50 = vor.u32 %v595_v39, %v591_v56 }
  0xac   : > { %4684 = vmatprep.subr.msk.bf16.mxu0 %vm646_vm0, %v5143_v8  ;;  %v1414_v8 = vrot.slane %v489_v49, 1 }
  0xad   : > { %v5186_v1 = vsel %vm493_vm4, %v596_v50, %v600_v31 }
  0xae   : > { %4048 = vmatprep.mubr.msk.bf16.mxu1 %vm348_vm1, %v5186_v1 }
  0xaf   : > { %4049 = vmatmul.mubr.msk.bf16.gmra.mrb[16].mxu1 %vm348_vm1, %v5191_v10 }
  0xb2   : > { %4125 = vmatmul.mubr.msk.bf16.gmra.mrb[4].mxu0 %vm348_vm1, %v5154_v17 }
  0xb3   : > { %4128 = vmatprep.mubr.msk.bf16.mxu0 %vm348_vm1, %v5159_v24 }
  0xba   : > { %4129 = vmatmul.mubr.msk.bf16.gmra.mrb[8].mxu0 %vm348_vm1, %v5171_v38 }
  0xbb   : > { %4132 = vmatprep.mubr.msk.bf16.mxu0 %vm348_vm1, %v5176_v46 }
  0xc2   : > { %4133 = vmatmul.mubr.msk.bf16.gmra.mrb[12].mxu0 %vm348_vm1, %v5186_v1 }
  0xc3   : > { %4136 = vmatprep.mubr.msk.bf16.mxu0 %vm348_vm1, %v5191_v10 }
  0xca   : > { %4137 = vmatmul.mubr.msk.bf16.gmra.mrb[16].mxu0 %vm348_vm1, %v1269_v26 }
  0xcb   : > { %4142 = vmatprep.mubr.msk.bf16.mxu0 %vm348_vm1, %v5004_v30  ;;  %v1413_v30 = vrot.slane %v5114_v35, 1 }
  0xcd   : > { %v1415_v28 = vsel %vm919_vm3, %v1413_v30, %v1414_v8 }
  0xd2   : > { %4143 = vmatmul.mubr.msk.bf16.vlgmr.msra.gmra.mrb[0].mxu0 %vm348_vm1, %v5010_v33 }
  0xd3   : > { %4163 = vmatpush3.bf16.msra.mxu0 %v1563_v27  ;;  %4146 = vmatprep.mubr.msk.bf16.mxu0 %vm348_vm1, %v5027_v42 }
  0xd4   : > { %4685 = vmatprep.subr.msk.bf16.mxu0 %vm646_vm0, %v3742_v37 }
  0xda   : > { %4147 = vmatmul.mubr.msk.bf16.gmra.mrb[4].mxu0 %vm348_vm1, %v5032_v44 }
  0xdb   : > { %4150 = vmatprep.mubr.msk.bf16.mxu0 %vm348_vm1, %v5045_v55 }
  0xe2   : > { %4151 = vmatmul.mubr.msk.bf16.gmra.mrb[8].mxu0 %vm348_vm1, %v5050_v57 }
  0xe3   : > { %4154 = vmatprep.mubr.msk.bf16.mxu0 %vm348_vm1, %v5063_v2 }
  0xea   : > { %4155 = vmatmul.mubr.msk.bf16.gmra.mrb[12].mxu0 %vm348_vm1, %v5068_v6 }
  0xeb   : > { %4158 = vmatprep.mubr.msk.bf16.mxu0 %vm348_vm1, %v5077_v9 }
  0xf2   : > { %4159 = vmatmul.mubr.msk.bf16.gmra.mrb[16].mxu0 %vm348_vm1, %v1415_v28 }
  0xf3   : > { %4164 = vmatprep.mubr.msk.bf16.mxu0 %vm348_vm1, %v4945_v54  ;;  %v465_v54 = vld [vmem:[#allocation2 + $0x108] sm:$0xff] }
  0xfa   : > { %4165 = vmatmul.mubr.msk.bf16.vlgmr.msra.gmra.mrb[0].mxu0 %vm348_vm1, %v4960_v61  ;;  %v466_v61 = vld [vmem:[#allocation2 + $0x110] sm:$0xff] }
  0xfb   : > { %4185 = vmatpush3.bf16.msra.mxu0 %v1715_v29  ;;  %4168 = vmatprep.mubr.msk.bf16.mxu0 %vm348_vm1, %v4962_v62  ;;  %v490_v62 = vpack.c.bf16 %v466_v61, %v465_v54 }
  0xfc   : > { %4686 = vmatprep.subr.msk.bf16.mxu0 %vm646_vm0, %v3753_v32 }
 0x102   : > { %4169 = vmatmul.mubr.msk.bf16.gmra.mrb[4].mxu0 %vm348_vm1, %v4969_v4  ;;  %v1861_v4 = vsel %vm646_vm0, %v3753_v32, 0 }
 0x103   : > { %4172 = vmatprep.mubr.msk.bf16.mxu0 %vm348_vm1, %v4971_v5  ;;  %v467_v5 = vld [vmem:[#allocation2 + $0x118] sm:$0x3] }
 0x10a   : > { %4173 = vmatmul.mubr.msk.bf16.gmra.mrb[8].mxu0 %vm348_vm1, %v4977_v11  ;;  %v491_v11 = vpack.c.bf16 %v467_v5, %v467_v5 }
 0x10b   : > { %4176 = vmatprep.mubr.msk.bf16.mxu0 %vm348_vm1, %v4979_v12  ;;  %v1700_v12 = vshll.u32 %v490_v62, 16 }
 0x112   : > { %4177 = vmatmul.mubr.msk.bf16.gmra.mrb[12].mxu0 %vm348_vm1, %v4989_v20  ;;  %v1698_v20 = vshrl.u32 %v490_v62, 16 }
 0x113   : > { %4180 = vmatprep.mubr.msk.bf16.mxu0 %vm348_vm1, %v5114_v35  ;;  %v1702_v35 = vrot.slane %v1700_v12, 1 }
 0x11a   : > { %4181 = vmatmul.mubr.msk.bf16.gmra.mrb[16].mxu0 %vm348_vm1, %v490_v62 }
 0x11b   : > { %4186 = vmatprep.mubr.msk.bf16.mxu0 %vm348_vm1, %v5131_v51  ;;  %v1705_v51 = vshll.u32 %v491_v11, 16 }
 0x122   : > { %4187 = vmatmul.mubr.msk.bf16.vlgmr.msra.gmra.mrb[0].mxu0 %vm348_vm1, %v5136_v63  ;;  %v1703_v63 = vor.u32 %v1702_v35, %v1698_v20 }
 0x123   : > { %4207 = vmatpush3.bf16.msra.mxu0 %v1861_v4  ;;  %4190 = vmatprep.mubr.msk.bf16.mxu0 %vm348_vm1, %v5154_v17  ;;  %v1707_v17 = vrot.slane %v1705_v51, 1 }
 0x12a   : > { %4191 = vmatmul.mubr.msk.bf16.gmra.mrb[4].mxu0 %vm348_vm1, %v5159_v24  ;;  %v1708_v24 = vsel %vm493_vm4, %v1703_v63, %v1707_v17 }
 0x12b   : > { %4194 = vmatprep.mubr.msk.bf16.mxu0 %vm348_vm1, %v5171_v38 }
 0x132   : > { %4195 = vmatmul.mubr.msk.bf16.gmra.mrb[8].mxu0 %vm348_vm1, %v5176_v46 }
 0x133   : > { %4198 = vmatprep.mubr.msk.bf16.mxu0 %vm348_vm1, %v5186_v1 }
 0x13a   : > { %4199 = vmatmul.mubr.msk.bf16.gmra.mrb[12].mxu0 %vm348_vm1, %v5191_v10 }
 0x13b   : > { %4202 = vmatprep.mubr.msk.bf16.mxu0 %vm348_vm1, %v1269_v26 }
 0x142   : > { %4203 = vmatmul.mubr.msk.bf16.gmra.mrb[16].mxu0 %vm348_vm1, %v1708_v24 }
 0x143   : > { %4208 = vmatprep.mubr.msk.bf16.mxu0 %vm348_vm1, %v5010_v33  ;;  %v1852_v33 = vrot.slane %v490_v62, 1 }
 0x14a   : > { %4209 = vmatmul.mubr.msk.bf16.vlgmr.msra.gmra.mrb[0].mxu0 %vm348_vm1, %v5027_v42  ;;  %v1853_v42 = vrot.slane %v491_v11, 1 }
 0x14b   : > { %4212 = vmatprep.mubr.msk.bf16.mxu0 %vm348_vm1, %v5032_v44 }
 0x14c   : > { %v1854_v44 = vsel %vm919_vm3, %v1852_v33, %v1853_v42 }
 0x152   : > { %4213 = vmatmul.mubr.msk.bf16.gmra.mrb[4].mxu0 %vm348_vm1, %v5045_v55 }
 0x153   : > { %4216 = vmatprep.mubr.msk.bf16.mxu0 %vm348_vm1, %v5050_v57 }
 0x15a   : > { %4217 = vmatmul.mubr.msk.bf16.gmra.mrb[8].mxu0 %vm348_vm1, %v5063_v2 }
 0x15b   : > { %4220 = vmatprep.mubr.msk.bf16.mxu0 %vm348_vm1, %v5068_v6 }
 0x160   : > { %v4034_v55 = vpop.f32.mrb[0].mxu1 }
 0x161   : > { %v684_v53 = vpop.f32.mrb[1].mxu1 }
 0x162   : > { %4221 = vmatmul.mubr.msk.bf16.gmra.mrb[12].mxu0 %vm348_vm1, %v5077_v9  ;;  %v4035_v57 = vpop.f32.mrb[2].mxu1 }
 0x163   : > { %4224 = vmatprep.mubr.msk.bf16.mxu0 %vm348_vm1, %v1415_v28  ;;  %v687_v45 = vpop.f32.mrb[3].mxu1 }
 0x168   : > { %v4038_v21 = vpop.f32.mrb[4].mxu1 }
 0x169   : > { %v700_v2 = vpop.f32.mrb[5].mxu1 }
 0x16a   : > { %4225 = vmatmul.mubr.msk.bf16.gmra.mrb[16].mxu0 %vm348_vm1, %v1854_v44  ;;  %v4039_v36 = vpop.f32.mrb[6].mxu1 }
 0x16b   : > { %v703_v38 = vpop.f32.mrb[7].mxu1 }
 0x170   : > { %v4042_v6 = vpop.f32.mrb[8].mxu1 }
 0x171   : > { %v5316_v56 = vpop.f32.mrb[9].mxu1 }
 0x172   : > { %v5318_v9 = vpop.f32.mrb[10].mxu1 }
 0x173   : > { %v5320_v39 = vpop.f32.mrb[11].mxu1 }
 0x178   : > { %v5322_v40 = vpop.f32.mrb[12].mxu1 }
 0x179   : > { %v5324_v41 = vpop.f32.mrb[13].mxu1 }
 0x17a   : > { %v5326_v46 = vpop.f32.mrb[14].mxu1 }
 0x17b   : > { %v5328_v23 = vpop.f32.mrb[15].mxu1 }
 0x182   : > { %v5330_v47 = vpop.f32.mrb[16].mxu1 }
 0x183   : > { %v5332_v48 = vpop.f32.mrb[17].mxu1 }
 0x184   : > { %v5334_v49 = vpop.f32.mrb[18].mxu1 }
 0x185   : > { %v5336_v50 = vpop.f32.mrb[19].mxu1 }
 0x21d   : > { %v4210_v31 = vpop.f32.mrb[0].mxu0 }
 0x21e   : > { %v4390_v59 = vadd.f32 %v4210_v31, %v4034_v55  ;;  %v1897_v60 = vpop.f32.mrb[1].mxu0 }
 0x21f   : > { %v4391_v0 = vadd.f32 %v1897_v60, %v684_v53  ;;  %v4211_v1 = vpop.f32.mrb[2].mxu0 }
 0x220   : > { %v2005_v7 = vadd.f32 %v4390_v59, %v5341_v58  ;;  %v4392_v3 = vadd.f32 %v4211_v1, %v4035_v57  ;;  %v1900_v34 = vpop.f32.mrb[3].mxu0 }
 0x221   : > { %v2003_v10 = vadd.f32 %v4391_v0, %v5341_v58  ;;  %v4393_v14 = vadd.f32 %v1900_v34, %v687_v45 }
 0x222   : > { %v2025_v15 = vmax.f32 %v2005_v7, 0.0  ;;  %v2006_v16 = vadd.f32 %v4392_v3, %v5341_v58 }
 0x223   : > { %v2023_v43 = vmax.f32 %v2003_v10, 0.0  ;;  %v2004_v18 = vadd.f32 %v4393_v14, %v5341_v58 }
 0x224   : > { %2045 = vst.msk [vmem:[#allocation3 + $0x19] sm:$0xff] %vm348_vm1, %v2025_v15  ;;  %v2026_v19 = vmax.f32 %v2006_v16, 0.0 }
 0x225   : > { %2065 = vst.msk [vmem:[#allocation3 + $0x17] sm:$0x2] %vm2063_vm5, %v2025_v15  ;;  %2064 = vst.msk [vmem:[#allocation3 - $0x1] sm:$0x2] %vm2063_vm5, %v2023_v43  ;;  %v2024_v22 = vmax.f32 %v2004_v18, 0.0  ;;  %v4214_v52 = vpop.f32.mrb[4].mxu0 }
 0x226   : > { %2043 = vst.msk [vmem:[#allocation3 + $0x1] sm:$0xff] %vm348_vm1, %v2023_v43  ;;  %2046 = vst.msk [vmem:[#allocation3 + $0x21] sm:$0xff] %vm348_vm1, %v2026_v19  ;;  %v4394_v25 = vadd.f32 %v4214_v52, %v4038_v21  ;;  %v1913_v13 = vpop.f32.mrb[5].mxu0 }
 0x227   : > { %2076 = vst.msk [vmem:[#allocation3 + $0x23] sm:$0x40] %vm2074_vm6, %v2026_v19  ;;  %2075 = vst.msk [vmem:[#allocation3 + $0xb] sm:$0x40] %vm2074_vm6, %v2024_v22  ;;  %v4395_v26 = vadd.f32 %v1913_v13, %v700_v2  ;;  %v4215_v27 = vpop.f32.mrb[6].mxu0 }
 0x228   : > { %2044 = vst.msk [vmem:[#allocation3 + $0x9] sm:$0xff] %vm348_vm1, %v2024_v22  ;;  %v2009_v37 = vadd.f32 %v4394_v25, %v5341_v58  ;;  %v4396_v30 = vadd.f32 %v4215_v27, %v4039_v36  ;;  %v1916_v8 = vpop.f32.mrb[7].mxu0 }
 0x229   : > { %v2007_v28 = vadd.f32 %v4395_v26, %v5341_v58  ;;  %v4397_v29 = vadd.f32 %v1916_v8, %v703_v38 }
 0x22a   : > { %v2029_v32 = vmax.f32 %v2009_v37, 0.0  ;;  %v2010_v54 = vadd.f32 %v4396_v30, %v5341_v58 }
 0x22b   : > { %v2027_v61 = vmax.f32 %v2007_v28, 0.0  ;;  %v2008_v62 = vadd.f32 %v4397_v29, %v5341_v58 }
 0x22c   : > { %2049 = vst.msk [vmem:[#allocation3 + $0x49] sm:$0xff] %vm348_vm1, %v2029_v32  ;;  %v2030_v4 = vmax.f32 %v2010_v54, 0.0 }
 0x22d   : > { %2067 = vst.msk [vmem:[#allocation3 + $0x47] sm:$0x2] %vm2063_vm5, %v2029_v32  ;;  %2066 = vst.msk [vmem:[#allocation3 + $0x2f] sm:$0x2] %vm2063_vm5, %v2027_v61  ;;  %v2028_v5 = vmax.f32 %v2008_v62, 0.0  ;;  %v4218_v11 = vpop.f32.mrb[8].mxu0 }
 0x22e   : > { %2047 = vst.msk [vmem:[#allocation3 + $0x31] sm:$0xff] %vm348_vm1, %v2027_v61  ;;  %2050 = vst.msk [vmem:[#allocation3 + $0x51] sm:$0xff] %vm348_vm1, %v2030_v4  ;;  %v4398_v12 = vadd.f32 %v4218_v11, %v4042_v6  ;;  %v1929_v20 = vpop.f32.mrb[9].mxu0 }
 0x22f   : > { %2078 = vst.msk [vmem:[#allocation3 + $0x53] sm:$0x40] %vm2074_vm6, %v2030_v4  ;;  %2077 = vst.msk [vmem:[#allocation3 + $0x3b] sm:$0x40] %vm2074_vm6, %v2028_v5  ;;  %v4399_v35 = vadd.f32 %v1929_v20, %v5316_v56  ;;  %v4219_v51 = vpop.f32.mrb[10].mxu0 }
 0x230   : > { %2048 = vst.msk [vmem:[#allocation3 + $0x39] sm:$0xff] %vm348_vm1, %v2028_v5  ;;  %v2013_v63 = vadd.f32 %v4398_v12, %v5341_v58  ;;  %v4400_v17 = vadd.f32 %v4219_v51, %v5318_v9  ;;  %v1932_v24 = vpop.f32.mrb[11].mxu0 }
 0x231   : > { %v2011_v33 = vadd.f32 %v4399_v35, %v5341_v58  ;;  %v4401_v42 = vadd.f32 %v1932_v24, %v5320_v39 }
 0x232   : > { %v2033_v44 = vmax.f32 %v2013_v63, 0.0  ;;  %v2014_v55 = vadd.f32 %v4400_v17, %v5341_v58 }
 0x233   : > { %v2031_v53 = vmax.f32 %v2011_v33, 0.0  ;;  %v2012_v57 = vadd.f32 %v4401_v42, %v5341_v58 }
 0x234   : > { %2053 = vst.msk [vmem:[#allocation3 + $0x79] sm:$0xff] %vm348_vm1, %v2033_v44  ;;  %v2034_v45 = vmax.f32 %v2014_v55, 0.0 }
 0x235   : > { %2069 = vst.msk [vmem:[#allocation3 + $0x77] sm:$0x2] %vm2063_vm5, %v2033_v44  ;;  %2068 = vst.msk [vmem:[#allocation3 + $0x5f] sm:$0x2] %vm2063_vm5, %v2031_v53  ;;  %v2032_v21 = vmax.f32 %v2012_v57, 0.0  ;;  %v4222_v2 = vpop.f32.mrb[12].mxu0 }
 0x236   : > { %2051 = vst.msk [vmem:[#allocation3 + $0x61] sm:$0xff] %vm348_vm1, %v2031_v53  ;;  %2054 = vst.msk [vmem:[#allocation3 + $0x81] sm:$0xff] %vm348_vm1, %v2034_v45  ;;  %v4402_v36 = vadd.f32 %v4222_v2, %v5322_v40  ;;  %v1945_v38 = vpop.f32.mrb[13].mxu0 }
 0x237   : > { %2080 = vst.msk [vmem:[#allocation3 + $0x83] sm:$0x40] %vm2074_vm6, %v2034_v45  ;;  %2079 = vst.msk [vmem:[#allocation3 + $0x6b] sm:$0x40] %vm2074_vm6, %v2032_v21  ;;  %v4403_v6 = vadd.f32 %v1945_v38, %v5324_v41  ;;  %v4223_v56 = vpop.f32.mrb[14].mxu0 }
 0x238   : > { %2052 = vst.msk [vmem:[#allocation3 + $0x69] sm:$0xff] %vm348_vm1, %v2032_v21  ;;  %v2017_v9 = vadd.f32 %v4402_v36, %v5341_v58  ;;  %v4404_v39 = vadd.f32 %v4223_v56, %v5326_v46  ;;  %v1948_v31 = vpop.f32.mrb[15].mxu0  ;;  %v2092_v13 = vld [vmem:[#allocation3 + $0x40] sm:$0x3] (!%p3765_p8) }
 0x239   : > { %v2015_v59 = vadd.f32 %v4403_v6, %v5341_v58  ;;  %v4405_v60 = vadd.f32 %v1948_v31, %v5328_v23  ;;  %2096 = vst.msk [vmem:[#allocation3 + $0x10] sm:$0x3] (!%p3765_p8), %vm2095_vm7, %v2092_v13 }
 0x23a   : > { %v2037_v0 = vmax.f32 %v2017_v9, 0.0  ;;  %v2018_v40 = vadd.f32 %v4404_v39, %v5341_v58 }
 0x23b   : > { %v2035_v1 = vmax.f32 %v2015_v59, 0.0  ;;  %v2016_v7 = vadd.f32 %v4405_v60, %v5341_v58 }
 0x23c   : > { %2057 = vst.msk [vmem:[#allocation3 + $0xa9] sm:$0xff] %vm348_vm1, %v2037_v0  ;;  %v2038_v41 = vmax.f32 %v2018_v40, 0.0 }
 0x23d   : > { %2071 = vst.msk [vmem:[#allocation3 + $0xa7] sm:$0x2] %vm2063_vm5, %v2037_v0  ;;  %2070 = vst.msk [vmem:[#allocation3 + $0x8f] sm:$0x2] %vm2063_vm5, %v2035_v1  ;;  %v2036_v46 = vmax.f32 %v2016_v7, 0.0  ;;  %v4226_v3 = vpop.f32.mrb[16].mxu0 }
 0x23e   : > { %2055 = vst.msk [vmem:[#allocation3 + $0x91] sm:$0xff] %vm348_vm1, %v2035_v1  ;;  %2058 = vst.msk [vmem:[#allocation3 + $0xb1] sm:$0xff] %vm348_vm1, %v2038_v41  ;;  %v4406_v23 = vadd.f32 %v4226_v3, %v5330_v47  ;;  %v1961_v34 = vpop.f32.mrb[17].mxu0 }
 0x23f   : > { %2082 = vst.msk [vmem:[#allocation3 + $0xb3] sm:$0x40] %vm2074_vm6, %v2038_v41  ;;  %2081 = vst.msk [vmem:[#allocation3 + $0x9b] sm:$0x40] %vm2074_vm6, %v2036_v46  ;;  %v4407_v10 = vadd.f32 %v1961_v34, %v5332_v48  ;;  %v4227_v14 = vpop.f32.mrb[18].mxu0 }
 0x240   : > { %2056 = vst.msk [vmem:[#allocation3 + $0x99] sm:$0xff] %vm348_vm1, %v2036_v46  ;;  %v2021_v15 = vadd.f32 %v4406_v23, %v5341_v58  ;;  %v4408_v16 = vadd.f32 %v4227_v14, %v5334_v49  ;;  %v1964_v43 = vpop.f32.mrb[19].mxu0 }
 0x241   : > { %v2019_v18 = vadd.f32 %v4407_v10, %v5341_v58  ;;  %v4409_v19 = vadd.f32 %v1964_v43, %v5336_v50  ;;  %v2090_v50 = vld [vmem:[#allocation3 + $0x30] sm:$0xff] (!%p3765_p8) }
 0x242   : > { %v2041_v22 = vmax.f32 %v2021_v15, 0.0  ;;  %v2022_v47 = vadd.f32 %v4408_v16, %v5341_v58  ;;  %2088 = sbr.rel (%p3765_p8) target bundleno = 585 (0x249), region = 48  ;;  %2093 = vst.msk [vmem:[#allocation3] sm:$0xff] (!%p3765_p8), %vm348_vm1, %v2090_v50 }
 0x243   : > { %v2039_v52 = vmax.f32 %v2019_v18, 0.0  ;;  %v2020_v25 = vadd.f32 %v4409_v19, %v5341_v58  ;;  %v2091_v58 = vld [vmem:[#allocation3 + $0x38] sm:$0xff] (!%p3765_p8) }
 0x244   : > { %2061 = vst.msk [vmem:[#allocation3 + $0xd9] sm:$0xff] %vm348_vm1, %v2041_v22  ;;  %v2042_v48 = vmax.f32 %v2022_v47, 0.0  ;;  %2094 = vst.msk [vmem:[#allocation3 + $0x8] sm:$0xff] (!%p3765_p8), %vm348_vm1, %v2091_v58 }
 0x245   : > { %2073 = vst.msk [vmem:[#allocation3 + $0xd7] sm:$0x2] %vm2063_vm5, %v2041_v22  ;;  %2072 = vst.msk [vmem:[#allocation3 + $0xbf] sm:$0x2] %vm2063_vm5, %v2039_v52  ;;  %v2040_v49 = vmax.f32 %v2020_v25, 0.0 }
 0x246   : > { %2059 = vst.msk [vmem:[#allocation3 + $0xc1] sm:$0xff] %vm348_vm1, %v2039_v52  ;;  %2062 = vst.msk [vmem:[#allocation3 + $0xe1] sm:$0xff] %vm348_vm1, %v2042_v48 }
 0x247   : > { %2084 = vst.msk [vmem:[#allocation3 + $0xe3] sm:$0x40] %vm2074_vm6, %v2042_v48  ;;  %2083 = vst.msk [vmem:[#allocation3 + $0xcb] sm:$0x40] %vm2074_vm6, %v2040_v49 }
 0x248   : > { %2060 = vst.msk [vmem:[#allocation3 + $0xc9] sm:$0xff] %vm348_vm1, %v2040_v49 }
 0x249 PF: > { %p3766_p9 = scmp.ne.s32.totalorder %s4758_s21, 1 }
 0x24a   : > { %v2102_v26 = vld [vmem:[#allocation3 + $0xa8] sm:$0xff] (!%p3766_p9)  ;;  %v2103_v27 = vld [vmem:[#allocation3 + $0xb0] sm:$0xff] (!%p3766_p9)  ;;  %v2104_v37 = vld [vmem:[#allocation3 + $0xb8] sm:$0x3] (!%p3766_p9)  ;;  %vm2108_vm8 = vcmask (!%p3766_p9), 25600  }
 0x24b   : > { %2100 = sbr.rel (%p3766_p9) target bundleno = 594 (0x252), region = 52  ;;  %2106 = vst.msk [vmem:[#allocation3 + $0xd8] sm:$0xff] (!%p3766_p9), %vm348_vm1, %v2102_v26  ;;  %2107 = vst.msk [vmem:[#allocation3 + $0xe0] sm:$0xff] (!%p3766_p9), %vm348_vm1, %v2103_v27 }
 0x24c   : > { %2109 = vst.msk [vmem:[#allocation3 + $0xe8] sm:$0x3] (!%p3766_p9), %vm2108_vm8, %v2104_v37 }
 0x252 PF: > { %v3767_v30 = vld [vmem:[%s5806_s4 + $0x2] sm:$0x3]  ;;  %v2111_v28 = vld [vmem:[#allocation3 + $0x8] sm:$0xff]  ;;  %v2112_v32 = vld [vmem:[#allocation3 + $0x10] sm:$0x3] }
 0x253   : > { %v2110_v8 = vld [vmem:[#allocation3] sm:$0xff]  ;;  %4687 = vmatprep.subr.msk.bf16.mxu1 %vm646_vm0, %v3767_v30  ;;  %v2284_v29 = vsel %vm646_vm0, %v3767_v30, 0  ;;  %v2113_v62 = vld [vmem:[#allocation3 + $0x18] sm:$0xff]  ;;  %v5430_v4 = vpack.c.bf16 %v2112_v32, %v2112_v32  ;;  %v2115_v11 = vld [vmem:[#allocation3 + $0x28] sm:$0x3] }
 0x254   : > { %v5425_v54 = vpack.c.bf16 %v2111_v28, %v2110_v8  ;;  %v2160_v61 = vld [vmem:[%s5806_s4] sm:$0x3]  ;;  %4229 = vmatpush3.bf16.msra.mxu1 %v2284_v29  ;;  %v2116_v12 = vld [vmem:[#allocation3 + $0x30] sm:$0xff]  ;;  %v5437_v63 = vpack.c.bf16 %v2115_v11, %v2115_v11  ;;  %v2117_v17 = vld [vmem:[#allocation3 + $0x38] sm:$0xff] }
 0x255   : > { %v2114_v5 = vld [vmem:[#allocation3 + $0x20] sm:$0xff]  ;;  %4688 = vmatprep.subr.msk.bf16.mxu1 %vm646_vm0, %v2160_v61  ;;  %v2169_v33 = vshll.u32 %v5430_v4, 16  ;;  %v2400_v42 = vsel %vm646_vm0, %v2160_v61, 0  ;;  %v5441_v44 = vpack.c.bf16 %v2117_v17, %v2116_v12  ;;  %v2119_v53 = vld [vmem:[#allocation3 + $0x48] sm:$0xff]  ;;  %v2120_v57 = vld [vmem:[#allocation3 + $0x50] sm:$0xff] }
 0x256   : > { %v2162_v20 = vshrl.u32 %v5425_v54, 16  ;;  %v2164_v35 = vshll.u32 %v5425_v54, 16  ;;  %v5435_v51 = vpack.c.bf16 %v2114_v5, %v2113_v62  ;;  %v2118_v24 = vld [vmem:[#allocation3 + $0x40] sm:$0x3]  ;;  %v2121_v45 = vld [vmem:[#allocation3 + $0x58] sm:$0x3]  ;;  %v5451_v1 = vpack.c.bf16 %v2120_v57, %v2119_v53 }
 0x257   : > { %v5443_v55 = vpack.c.bf16 %v2118_v24, %v2118_v24  ;;  %v2181_v38 = vshll.u32 %v5437_v63, 16  ;;  %v2122_v6 = vld [vmem:[#allocation3 + $0x60] sm:$0xff]  ;;  %v2123_v56 = vld [vmem:[#allocation3 + $0x68] sm:$0xff]  ;;  %v2171_v9 = vrot.slane %v2169_v33, 1  ;;  %v2186_v39 = vshrl.u32 %v5441_v44, 16  ;;  %v2125_v34 = vld [vmem:[#allocation3 + $0x78] sm:$0xff] }
 0x258   : > { %v2166_v21 = vrot.slane %v2164_v35, 1  ;;  %v2174_v2 = vshrl.u32 %v5435_v51, 16  ;;  %v2176_v36 = vshll.u32 %v5435_v51, 16  ;;  %v2188_v31 = vshll.u32 %v5441_v44, 16  ;;  %v2124_v7 = vld [vmem:[#allocation3 + $0x70] sm:$0x3] }
 0x259   : > { %v2193_v59 = vshll.u32 %v5443_v55, 16  ;;  %v2183_v40 = vrot.slane %v2181_v38, 1  ;;  %v5453_v3 = vpack.c.bf16 %v2121_v45, %v2121_v45  ;;  %v5455_v23 = vpack.c.bf16 %v2123_v56, %v2122_v6  ;;  %v2126_v10 = vld [vmem:[#allocation3 + $0x80] sm:$0xff]  ;;  %v2127_v52 = vld [vmem:[#allocation3 + $0x88] sm:$0x3]  ;;  %v2128_v25 = vld [vmem:[#allocation3 + $0x90] sm:$0xff] }
 0x25a   : > { %v2167_v60 = vor.u32 %v2166_v21, %v2162_v20  ;;  %v2178_v0 = vrot.slane %v2176_v36, 1  ;;  %v2190_v41 = vrot.slane %v2188_v31, 1  ;;  %v2198_v16 = vshrl.u32 %v5451_v1, 16  ;;  %v2129_v48 = vld [vmem:[#allocation3 + $0x98] sm:$0xff]  ;;  %v2130_v26 = vld [vmem:[#allocation3 + $0xa0] sm:$0x3] }
 0x25b   : > { %v2195_v46 = vrot.slane %v2193_v59, 1  ;;  %v2200_v43 = vshll.u32 %v5451_v1, 16  ;;  %v2205_v19 = vshll.u32 %v5453_v3, 16  ;;  %v5462_v22 = vpack.c.bf16 %v2124_v7, %v2124_v7  ;;  %v3784_v27 = vld [vmem:[%s5806_s4 + $0x4] sm:$0x3]  ;;  %v2131_v12 = vld [vmem:[#allocation3 + $0xa8] sm:$0xff] }
 0x25c   : > { %v2172_v14 = vsel %vm493_vm4, %v2167_v60, %v2171_v9  ;;  %v2179_v15 = vor.u32 %v2178_v0, %v2174_v2  ;;  %v2191_v18 = vor.u32 %v2190_v41, %v2186_v39  ;;  %v2210_v47 = vshrl.u32 %v5455_v23, 16  ;;  %v2132_v20 = vld [vmem:[#allocation3 + $0xb0] sm:$0xff]  ;;  %v2133_v38 = vld [vmem:[#allocation3 + $0xb8] sm:$0x3] }
 0x25d   : > { %4230 = vmatprep.mubr.msk.bf16.mxu1 %vm348_vm1, %v2172_v14  ;;  %v2202_v50 = vrot.slane %v2200_v43, 1  ;;  %v2212_v58 = vshll.u32 %v5455_v23, 16  ;;  %v5469_v13 = vpack.c.bf16 %v2126_v10, %v2125_v34  ;;  %v2207_v30 = vrot.slane %v2205_v19, 1 }
 0x25e   : > { %v5466_v49 = vsel %vm493_vm4, %v2179_v15, %v2183_v40  ;;  %v5477_v37 = vsel %vm493_vm4, %v2191_v18, %v2195_v46  ;;  %v2217_v8 = vshll.u32 %v5462_v22, 16  ;;  %v5482_v32 = vpack.c.bf16 %v2127_v52, %v2127_v52  ;;  %v3793_v15 = vld [vmem:[%s5806_s4 + $0x6] sm:$0x3] }
 0x25f   : > { %4231 = vmatmul.mubr.msk.bf16.vlgmr.msra.gmra.mrb[20].mxu1 %vm348_vm1, %v5466_v49  ;;  %v2203_v28 = vor.u32 %v2202_v50, %v2198_v16  ;;  %v2214_v29 = vrot.slane %v2212_v58, 1  ;;  %v2224_v61 = vshll.u32 %v5469_v13, 16  ;;  %v5485_v5 = vpack.c.bf16 %v2129_v48, %v2128_v25  ;;  %v3802_v50 = vld [vmem:[%s5806_s4 + $0x8] sm:$0x3] }
 0x260   : > { %4247 = vmatpush3.bf16.msra.mxu1 %v2400_v42  ;;  %4234 = vmatprep.mubr.msk.bf16.mxu1 %vm348_vm1, %v5477_v37  ;;  %v2219_v62 = vrot.slane %v2217_v8, 1  ;;  %v5487_v11 = vpack.c.bf16 %v2130_v26, %v2130_v26  ;;  %v2222_v17 = vshrl.u32 %v5469_v13, 16  ;;  %v2229_v53 = vshll.u32 %v5482_v32, 16 }
 0x261   : > { %4689 = vmatprep.subr.msk.bf16.mxu1 %vm646_vm0, %v3784_v27  ;;  %v2215_v35 = vor.u32 %v2214_v29, %v2210_v47  ;;  %v2236_v24 = vshll.u32 %v5485_v5, 16  ;;  %v5493_v33 = vsel %vm493_vm4, %v2203_v28, %v2207_v30  ;;  %v2226_v42 = vrot.slane %v2224_v61, 1 }
 0x262   : > { %v5496_v57 = vpack.c.bf16 %v2132_v20, %v2131_v12  ;;  %v2234_v21 = vshrl.u32 %v5485_v5, 16  ;;  %v2241_v36 = vshll.u32 %v5487_v11, 16  ;;  %v2231_v56 = vrot.slane %v2229_v53, 1  ;;  %v3811_v20 = vld [vmem:[%s5806_s4 + $0xa] sm:$0x3] }
 0x263   : > { %v5499_v45 = vsel %vm493_vm4, %v2215_v35, %v2219_v62  ;;  %v2238_v2 = vrot.slane %v2236_v24, 1  ;;  %v2227_v6 = vor.u32 %v2226_v42, %v2222_v17  ;;  %v5507_v9 = vpack.c.bf16 %v2133_v38, %v2133_v38  ;;  %v2135_v35 = vld [vmem:[#allocation3 + $0xc8] sm:$0xff]  ;;  %v2136_v53 = vld [vmem:[#allocation3 + $0xd0] sm:$0x3] }
 0x264   : > { %v2248_v39 = vshll.u32 %v5496_v57, 16  ;;  %v2243_v59 = vrot.slane %v2241_v36, 1  ;;  %v2246_v0 = vshrl.u32 %v5496_v57, 16  ;;  %v2566_v14 = vsel %vm646_vm0, %v3784_v27, 0  ;;  %v3820_v42 = vld [vmem:[%s5806_s4 + $0xc] sm:$0x3] }
 0x265   : > { %v2239_v31 = vor.u32 %v2238_v2, %v2234_v21  ;;  %v5511_v60 = vsel %vm493_vm4, %v2227_v6, %v2231_v56  ;;  %v2253_v7 = vshll.u32 %v5507_v9, 16  ;;  %v2515_v16 = vrot.slane %v5425_v54, 1 }
 0x266   : > { %v2250_v40 = vrot.slane %v2248_v39, 1  ;;  %v2516_v43 = vrot.slane %v5430_v4, 1  ;;  %v2518_v19 = vrot.slane %v5435_v51, 1  ;;  %v2519_v47 = vrot.slane %v5437_v63, 1 }
 0x267   : > { %4235 = vmatmul.mubr.msk.bf16.gmra.mrb[24].mxu1 %vm348_vm1, %v5493_v33  ;;  %v5516_v41 = vsel %vm493_vm4, %v2239_v31, %v2243_v59  ;;  %v2255_v34 = vrot.slane %v2253_v7, 1  ;;  %v2521_v52 = vrot.slane %v5441_v44, 1  ;;  %v2522_v25 = vrot.slane %v5443_v55, 1  ;;  %v3829_v31 = vld [vmem:[%s5806_s4 + $0xe] sm:$0x3] }
 0x268   : > { %4238 = vmatprep.mubr.msk.bf16.mxu1 %vm348_vm1, %v5499_v45  ;;  %v2251_v46 = vor.u32 %v2250_v40, %v2246_v0  ;;  %v2517_v18 = vsel %vm919_vm3, %v2515_v16, %v2516_v43  ;;  %v5557_v48 = vsel %vm919_vm3, %v2518_v19, %v2519_v47  ;;  %v2524_v63 = vrot.slane %v5451_v1, 1  ;;  %v3441_v43 = vld [vmem:[%s4864_s16 + $0x10] sm:$0xff]  ;;  %v5723_v47 = vld [vmem:[%s5807_s5] ss:$0 sm:$0xff] }
 0x269   : > { %v5561_v4 = vsel %vm919_vm3, %v2521_v52, %v2522_v25  ;;  %v2525_v55 = vrot.slane %v5453_v3, 1  ;;  %v2527_v58 = vrot.slane %v5455_v23, 1  ;;  %v2528_v26 = vrot.slane %v5462_v22, 1  ;;  %v3442_v52 = vld [vmem:[%s4864_s16 + $0x18] sm:$0xff] }
 0x26a   : > { %v5523_v10 = vsel %vm493_vm4, %v2251_v46, %v2255_v34  ;;  %v2530_v3 = vrot.slane %v5469_v13, 1  ;;  %v2531_v8 = vrot.slane %v5482_v32, 1  ;;  %v2533_v22 = vrot.slane %v5485_v5, 1  ;;  %v3838_v46 = vld [vmem:[%s5806_s4 + $0x10] sm:$0x3]  ;;  %v2138_v34 = vld [vmem:[#allocation3 + $0xe0] sm:$0xff] }
 0x26b   : > { %v5576_v27 = vsel %vm919_vm3, %v2524_v63, %v2525_v55  ;;  %v5579_v30 = vsel %vm919_vm3, %v2527_v58, %v2528_v26  ;;  %v2534_v28 = vrot.slane %v5487_v11, 1  ;;  %v2536_v62 = vrot.slane %v5496_v57, 1 }
 0x26c   : > { %v5590_v29 = vsel %vm919_vm3, %v2530_v3, %v2531_v8  ;;  %v2537_v32 = vrot.slane %v5507_v9, 1  ;;  %v2819_v11 = vsel %vm646_vm0, %v3802_v50, 0  ;;  %v2945_v24 = vsel %vm646_vm0, %v3811_v20, 0 }
 0x26d   : > { %v5593_v61 = vsel %vm919_vm3, %v2533_v22, %v2534_v28  ;;  %v3066_v39 = vsel %vm646_vm0, %v3820_v42, 0  ;;  %v3198_v7 = vsel %vm646_vm0, %v3829_v31, 0  ;;  %v3445_v28 = vld [vmem:[%s4864_s16 + $0x30] sm:$0xff] }
 0x26e   : > { %v5602_v12 = vsel %vm919_vm3, %v2536_v62, %v2537_v32 }
 0x26f   : > { %4239 = vmatmul.mubr.msk.bf16.gmra.mrb[28].mxu1 %vm348_vm1, %v5511_v60 }
 0x270   : > { %4242 = vmatprep.mubr.msk.bf16.mxu1 %vm348_vm1, %v5516_v41 }
 0x277   : > { %4243 = vmatmul.mubr.msk.bf16.gmra.mrb[32].mxu1 %vm348_vm1, %v5523_v10 }
 0x278   : > { %4248 = vmatprep.mubr.msk.bf16.mxu1 %vm348_vm1, %v5425_v54  ;;  %v2687_v54 = vsel %vm646_vm0, %v3793_v15, 0 }
 0x27f   : > { %4249 = vmatmul.mubr.msk.bf16.vlgmr.msra.gmra.mrb[20].mxu1 %vm348_vm1, %v5435_v51 }
 0x280   : > { %4265 = vmatpush3.bf16.msra.mxu1 %v2566_v14  ;;  %4252 = vmatprep.mubr.msk.bf16.mxu1 %vm348_vm1, %v5441_v44 }
 0x281   : > { %4690 = vmatprep.subr.msk.bf16.mxu1 %vm646_vm0, %v3793_v15 }
 0x287   : > { %4253 = vmatmul.mubr.msk.bf16.gmra.mrb[24].mxu1 %vm348_vm1, %v5451_v1 }
 0x288   : > { %4256 = vmatprep.mubr.msk.bf16.mxu1 %vm348_vm1, %v5455_v23 }
 0x28f   : > { %4257 = vmatmul.mubr.msk.bf16.gmra.mrb[28].mxu1 %vm348_vm1, %v5469_v13 }
 0x290   : > { %4260 = vmatprep.mubr.msk.bf16.mxu1 %vm348_vm1, %v5485_v5 }
 0x297   : > { %4261 = vmatmul.mubr.msk.bf16.gmra.mrb[32].mxu1 %vm348_vm1, %v5496_v57 }
 0x298   : > { %4266 = vmatprep.mubr.msk.bf16.mxu1 %vm348_vm1, %v2517_v18  ;;  %v3439_v18 = vld [vmem:[%s4864_s16] sm:$0xff] }
 0x29f   : > { %4267 = vmatmul.mubr.msk.bf16.vlgmr.msra.gmra.mrb[20].mxu1 %vm348_vm1, %v5557_v48 }
 0x2a0   : > { %4283 = vmatpush3.bf16.msra.mxu1 %v2687_v54  ;;  %4270 = vmatprep.mubr.msk.bf16.mxu1 %vm348_vm1, %v5561_v4  ;;  %v3440_v54 = vld [vmem:[%s4864_s16 + $0x8] sm:$0xff] }
 0x2a1   : > { %4691 = vmatprep.subr.msk.bf16.mxu1 %vm646_vm0, %v3802_v50 }
 0x2a7   : > { %4271 = vmatmul.mubr.msk.bf16.gmra.mrb[24].mxu1 %vm348_vm1, %v5576_v27 }
 0x2a8   : > { %4274 = vmatprep.mubr.msk.bf16.mxu1 %vm348_vm1, %v5579_v30 }
 0x2af   : > { %4275 = vmatmul.mubr.msk.bf16.gmra.mrb[28].mxu1 %vm348_vm1, %v5590_v29 }
 0x2b0   : > { %4278 = vmatprep.mubr.msk.bf16.mxu1 %vm348_vm1, %v5593_v61 }
 0x2b7   : > { %4279 = vmatmul.mubr.msk.bf16.gmra.mrb[32].mxu1 %vm348_vm1, %v5602_v12 }
 0x2b8   : > { %4284 = vmatprep.mubr.msk.bf16.mxu1 %vm348_vm1, %v5435_v51  ;;  %v2134_v51 = vld [vmem:[#allocation3 + $0xc0] sm:$0xff] }
 0x2b9   : > { %v2156_v17 = vpack.c.bf16 %v2135_v35, %v2134_v51  ;;  %v3444_v51 = vld [vmem:[%s4864_s16 + $0x28] sm:$0xff] }
 0x2bb   : > { %v2804_v21 = vshll.u32 %v2156_v17, 16  ;;  %v2802_v2 = vshrl.u32 %v2156_v17, 16  ;;  %v2936_v59 = vrot.slane %v2156_v17, 1 }
 0x2bd   : > { %v2806_v36 = vrot.slane %v2804_v21, 1 }
 0x2bf   : > { %4285 = vmatmul.mubr.msk.bf16.vlgmr.msra.gmra.mrb[20].mxu1 %vm348_vm1, %v5441_v44  ;;  %v2807_v6 = vor.u32 %v2806_v36, %v2802_v2 }
 0x2c0   : > { %4301 = vmatpush3.bf16.msra.mxu1 %v2819_v11  ;;  %4288 = vmatprep.mubr.msk.bf16.mxu1 %vm348_vm1, %v5451_v1 }
 0x2c1   : > { %4692 = vmatprep.subr.msk.bf16.mxu1 %vm646_vm0, %v3811_v20 }
 0x2c7   : > { %4289 = vmatmul.mubr.msk.bf16.gmra.mrb[24].mxu1 %vm348_vm1, %v5455_v23 }
 0x2c8   : > { %4292 = vmatprep.mubr.msk.bf16.mxu1 %vm348_vm1, %v5469_v13 }
 0x2cf   : > { %4293 = vmatmul.mubr.msk.bf16.gmra.mrb[28].mxu1 %vm348_vm1, %v5485_v5 }
 0x2d0   : > { %4296 = vmatprep.mubr.msk.bf16.mxu1 %vm348_vm1, %v5496_v57 }
 0x2d7   : > { %4297 = vmatmul.mubr.msk.bf16.gmra.mrb[32].mxu1 %vm348_vm1, %v2156_v17 }
 0x2d8   : > { %4302 = vmatprep.mubr.msk.bf16.mxu1 %vm348_vm1, %v5466_v49  ;;  %v2157_v49 = vpack.c.bf16 %v2136_v53, %v2136_v53 }
 0x2da   : > { %v2809_v38 = vshll.u32 %v2157_v49, 16  ;;  %v2937_v0 = vrot.slane %v2157_v49, 1 }
 0x2dc   : > { %v2811_v56 = vrot.slane %v2809_v38, 1  ;;  %v2938_v40 = vsel %vm919_vm3, %v2936_v59, %v2937_v0  ;;  %v3450_v0 = vld [vmem:[%s4864_s16 + $0x58] sm:$0xff] }
 0x2de   : > { %v2812_v9 = vsel %vm493_vm4, %v2807_v6, %v2811_v56  ;;  %v3449_v56 = vld [vmem:[%s4864_s16 + $0x50] sm:$0xff] }
 0x2df   : > { %4303 = vmatmul.mubr.msk.bf16.vlgmr.msra.gmra.mrb[20].mxu1 %vm348_vm1, %v5477_v37 }
 0x2e0   : > { %4319 = vmatpush3.bf16.msra.mxu1 %v2945_v24  ;;  %4306 = vmatprep.mubr.msk.bf16.mxu1 %vm348_vm1, %v5493_v33 }
 0x2e1   : > { %4693 = vmatprep.subr.msk.bf16.mxu1 %vm646_vm0, %v3820_v42 }
 0x2e7   : > { %4307 = vmatmul.mubr.msk.bf16.gmra.mrb[24].mxu1 %vm348_vm1, %v5499_v45 }
 0x2e8   : > { %4310 = vmatprep.mubr.msk.bf16.mxu1 %vm348_vm1, %v5511_v60 }
 0x2ef   : > { %4311 = vmatmul.mubr.msk.bf16.gmra.mrb[28].mxu1 %vm348_vm1, %v5516_v41 }
 0x2f0   : > { %4314 = vmatprep.mubr.msk.bf16.mxu1 %vm348_vm1, %v5523_v10 }
 0x2f7   : > { %4315 = vmatmul.mubr.msk.bf16.gmra.mrb[32].mxu1 %vm348_vm1, %v2812_v9 }
 0x2f8   : > { %4320 = vmatprep.mubr.msk.bf16.mxu1 %vm348_vm1, %v5557_v48 }
 0x2ff   : > { %4321 = vmatmul.mubr.msk.bf16.vlgmr.msra.gmra.mrb[20].mxu1 %vm348_vm1, %v5561_v4 }
 0x300   : > { %4337 = vmatpush3.bf16.msra.mxu1 %v3066_v39  ;;  %4324 = vmatprep.mubr.msk.bf16.mxu1 %vm348_vm1, %v5576_v27  ;;  %v3447_v39 = vld [vmem:[%s4864_s16 + $0x40] sm:$0xff] }
 0x301   : > { %4694 = vmatprep.subr.msk.bf16.mxu1 %vm646_vm0, %v3829_v31 }
 0x307   : > { %4325 = vmatmul.mubr.msk.bf16.gmra.mrb[24].mxu1 %vm348_vm1, %v5579_v30 }
 0x308   : > { %4328 = vmatprep.mubr.msk.bf16.mxu1 %vm348_vm1, %v5590_v29 }
 0x30f   : > { %4329 = vmatmul.mubr.msk.bf16.gmra.mrb[28].mxu1 %vm348_vm1, %v5593_v61 }
 0x310   : > { %4332 = vmatprep.mubr.msk.bf16.mxu1 %vm348_vm1, %v5602_v12 }
 0x317   : > { %4333 = vmatmul.mubr.msk.bf16.gmra.mrb[32].mxu1 %vm348_vm1, %v2938_v40 }
 0x318   : > { %4338 = vmatprep.mubr.msk.bf16.mxu1 %vm348_vm1, %v5441_v44  ;;  %v2137_v44 = vld [vmem:[#allocation3 + $0xd8] sm:$0xff] }
 0x31f   : > { %4339 = vmatmul.mubr.msk.bf16.vlgmr.msra.gmra.mrb[20].mxu1 %vm348_vm1, %v5451_v1  ;;  %v2158_v1 = vpack.c.bf16 %v2138_v34, %v2137_v44 }
 0x320   : > { %4355 = vmatpush3.bf16.msra.mxu1 %v3198_v7  ;;  %4342 = vmatprep.mubr.msk.bf16.mxu1 %vm348_vm1, %v5455_v23  ;;  %v3324_v23 = vsel %vm646_vm0, %v3838_v46, 0 }
 0x321   : > { %4695 = vmatprep.subr.msk.bf16.mxu1 %vm646_vm0, %v3838_v46  ;;  %v3181_v14 = vshrl.u32 %v2158_v1, 16  ;;  %v3448_v46 = vld [vmem:[%s4864_s16 + $0x48] sm:$0xff] }
 0x327   : > { %4343 = vmatmul.mubr.msk.bf16.gmra.mrb[24].mxu1 %vm348_vm1, %v5469_v13  ;;  %v2139_v13 = vld [vmem:[#allocation3 + $0xe8] sm:$0x3] }
 0x328   : > { %4346 = vmatprep.mubr.msk.bf16.mxu1 %vm348_vm1, %v5485_v5  ;;  %v2159_v5 = vpack.c.bf16 %v2139_v13, %v2139_v13 }
 0x32a   : > { %v3188_v15 = vshll.u32 %v2159_v5, 16 }
 0x32f   : > { %4347 = vmatmul.mubr.msk.bf16.gmra.mrb[28].mxu1 %vm348_vm1, %v5496_v57  ;;  %v3183_v57 = vshll.u32 %v2158_v1, 16 }
 0x330   : > { %4350 = vmatprep.mubr.msk.bf16.mxu1 %vm348_vm1, %v2156_v17 }
 0x337   : > { %4351 = vmatmul.mubr.msk.bf16.gmra.mrb[32].mxu1 %vm348_vm1, %v2158_v1 }
 0x338   : > { %4356 = vmatprep.mubr.msk.bf16.mxu1 %vm348_vm1, %v5477_v37  ;;  %v3185_v37 = vrot.slane %v3183_v57, 1 }
 0x33f   : > { %4357 = vmatmul.mubr.msk.bf16.vlgmr.msra.gmra.mrb[20].mxu1 %vm348_vm1, %v5493_v33  ;;  %v3186_v33 = vor.u32 %v3185_v37, %v3181_v14 }
 0x340   : > { %4373 = vmatpush3.bf16.msra.mxu1 %v3324_v23  ;;  %4360 = vmatprep.mubr.msk.bf16.mxu1 %vm348_vm1, %v5499_v45  ;;  %v3190_v45 = vrot.slane %v3188_v15, 1 }
 0x342   : > { %v3191_v16 = vsel %vm493_vm4, %v3186_v33, %v3190_v45  ;;  %v3453_v45 = vld [vmem:[%s4864_s16 + $0x70] sm:$0xff] }
 0x347   : > { %4361 = vmatmul.mubr.msk.bf16.gmra.mrb[24].mxu1 %vm348_vm1, %v5511_v60  ;;  %v3315_v60 = vrot.slane %v2158_v1, 1 }
 0x348   : > { %4364 = vmatprep.mubr.msk.bf16.mxu1 %vm348_vm1, %v5516_v41  ;;  %v3316_v41 = vrot.slane %v2159_v5, 1 }
 0x34f   : > { %4365 = vmatmul.mubr.msk.bf16.gmra.mrb[28].mxu1 %vm348_vm1, %v5523_v10  ;;  %v3317_v10 = vsel %vm919_vm3, %v3315_v60, %v3316_v41  ;;  %v3451_v60 = vld [vmem:[%s4864_s16 + $0x60] sm:$0xff] }
 0x350   : > { %4368 = vmatprep.mubr.msk.bf16.mxu1 %vm348_vm1, %v2812_v9 }
 0x357   : > { %4369 = vmatmul.mubr.msk.bf16.gmra.mrb[32].mxu1 %vm348_vm1, %v3191_v16 }
 0x358   : > { %4374 = vmatprep.mubr.msk.bf16.mxu1 %vm348_vm1, %v5561_v4 }
 0x35f   : > { %4375 = vmatmul.mubr.msk.bf16.vlgmr.msra.gmra.mrb[20].mxu1 %vm348_vm1, %v5576_v27 }
 0x360   : > { %4378 = vmatprep.mubr.msk.bf16.mxu1 %vm348_vm1, %v5579_v30 }
 0x367   : > { %4379 = vmatmul.mubr.msk.bf16.gmra.mrb[24].mxu1 %vm348_vm1, %v5590_v29 }
 0x368   : > { %4382 = vmatprep.mubr.msk.bf16.mxu1 %vm348_vm1, %v5593_v61  ;;  %v3443_v61 = vld [vmem:[%s4864_s16 + $0x20] sm:$0xff] }
 0x36f   : > { %4383 = vmatmul.mubr.msk.bf16.gmra.mrb[28].mxu1 %vm348_vm1, %v5602_v12  ;;  %v3446_v12 = vld [vmem:[%s4864_s16 + $0x38] sm:$0xff] }
 0x370   : > { %4386 = vmatprep.mubr.msk.bf16.mxu1 %vm348_vm1, %v2938_v40 }
 0x377   : > { %4387 = vmatmul.mubr.msk.bf16.gmra.mrb[32].mxu1 %vm348_vm1, %v3317_v10 }
 0x432   : > { %v4376_v19 = vpop.f32.mrb[20].mxu1 }
 0x433   : > { %v3457_v25 = vadd.f32 %v4376_v19, %v3441_v43  ;;  %v3360_v48 = vpop.f32.mrb[21].mxu1  ;;  %v3454_v43 = vld [vmem:[%s4864_s16 + $0x78] sm:$0xff] }
 0x434   : > { %v3455_v4 = vadd.f32 %v3439_v18, %v3360_v48  ;;  %v4377_v50 = vpop.f32.mrb[22].mxu1 }
 0x435   : > { %v3480_v63 = vadd.f32 %v5723_v47, %v3457_v25  ;;  %v3458_v55 = vadd.f32 %v4377_v50, %v3442_v52  ;;  %v3363_v58 = vpop.f32.mrb[23].mxu1  ;;  %v3452_v52 = vld [vmem:[%s4864_s16 + $0x68] sm:$0xff] }
 0x436   : > { %v3478_v26 = vadd.f32 %v5723_v47, %v3455_v4  ;;  %v3456_v27 = vadd.f32 %v3440_v54, %v3363_v58 }
 0x437   : > { %v3496_v30 = vmax.f32 %v3480_v63, 0.0  ;;  %v3481_v3 = vadd.f32 %v5723_v47, %v3458_v55 }
 0x438   : > { %v3494_v8 = vmax.f32 %v3478_v26, 0.0  ;;  %v3479_v22 = vadd.f32 %v5723_v47, %v3456_v27 }
 0x439   : > { %3512 = vst.msk [vmem:[%s4869_s19 + $0x10] sm:$0xff] %vm348_vm1, %v3496_v30  ;;  %v3497_v29 = vmax.f32 %v3481_v3, 0.0 }
 0x43a   : > { %3510 = vst.msk [vmem:[%s4869_s19] sm:$0xff] %vm348_vm1, %v3494_v8  ;;  %v3495_v62 = vmax.f32 %v3479_v22, 0.0  ;;  %v4380_v32 = vpop.f32.mrb[24].mxu1 }
 0x43b   : > { %3513 = vst.msk [vmem:[%s4869_s19 + $0x18] sm:$0xff] %vm348_vm1, %v3497_v29  ;;  %v3461_v11 = vadd.f32 %v4380_v32, %v3445_v28  ;;  %v3376_v20 = vpop.f32.mrb[25].mxu1 }
 0x43c   : > { %3511 = vst.msk [vmem:[%s4869_s19 + $0x8] sm:$0xff] %vm348_vm1, %v3495_v62  ;;  %v3459_v35 = vadd.f32 %v3443_v61, %v3376_v20  ;;  %v4381_v17 = vpop.f32.mrb[26].mxu1 }
 0x43d   : > { %v3484_v24 = vadd.f32 %v5723_v47, %v3461_v11  ;;  %v3462_v42 = vadd.f32 %v4381_v17, %v3446_v12  ;;  %v3379_v53 = vpop.f32.mrb[27].mxu1 }
 0x43e   : > { %v3482_v49 = vadd.f32 %v5723_v47, %v3459_v35  ;;  %v3460_v21 = vadd.f32 %v3444_v51, %v3379_v53 }
 0x43f   : > { %v3500_v2 = vmax.f32 %v3484_v24, 0.0  ;;  %v3485_v36 = vadd.f32 %v5723_v47, %v3462_v42 }
 0x440   : > { %v3498_v38 = vmax.f32 %v3482_v49, 0.0  ;;  %v3483_v6 = vadd.f32 %v5723_v47, %v3460_v21 }
 0x441   : > { %3516 = vst.msk [vmem:[%s4869_s19 + $0x30] sm:$0xff] %vm348_vm1, %v3500_v2  ;;  %v3501_v9 = vmax.f32 %v3485_v36, 0.0 }
 0x442   : > { %3514 = vst.msk [vmem:[%s4869_s19 + $0x20] sm:$0xff] %vm348_vm1, %v3498_v38  ;;  %v3499_v31 = vmax.f32 %v3483_v6, 0.0  ;;  %v4384_v59 = vpop.f32.mrb[28].mxu1 }
 0x443   : > { %3517 = vst.msk [vmem:[%s4869_s19 + $0x38] sm:$0xff] %vm348_vm1, %v3501_v9  ;;  %v3465_v40 = vadd.f32 %v4384_v59, %v3449_v56  ;;  %v3392_v7 = vpop.f32.mrb[29].mxu1 }
 0x444   : > { %3515 = vst.msk [vmem:[%s4869_s19 + $0x28] sm:$0xff] %vm348_vm1, %v3499_v31  ;;  %v3463_v44 = vadd.f32 %v3447_v39, %v3392_v7  ;;  %v4385_v34 = vpop.f32.mrb[30].mxu1 }
 0x445   : > { %v3488_v1 = vadd.f32 %v5723_v47, %v3465_v40  ;;  %v3466_v23 = vadd.f32 %v4385_v34, %v3450_v0  ;;  %v3395_v13 = vpop.f32.mrb[31].mxu1 }
 0x446   : > { %v3486_v5 = vadd.f32 %v5723_v47, %v3463_v44  ;;  %v3464_v57 = vadd.f32 %v3448_v46, %v3395_v13 }
 0x447   : > { %v3504_v14 = vmax.f32 %v3488_v1, 0.0  ;;  %v3489_v37 = vadd.f32 %v5723_v47, %v3466_v23 }
 0x448   : > { %v3502_v15 = vmax.f32 %v3486_v5, 0.0  ;;  %v3487_v33 = vadd.f32 %v5723_v47, %v3464_v57 }
 0x449   : > { %3520 = vst.msk [vmem:[%s4869_s19 + $0x50] sm:$0xff] %vm348_vm1, %v3504_v14  ;;  %v3505_v16 = vmax.f32 %v3489_v37, 0.0 }
 0x44a   : > { %3518 = vst.msk [vmem:[%s4869_s19 + $0x40] sm:$0xff] %vm348_vm1, %v3502_v15  ;;  %v3503_v41 = vmax.f32 %v3487_v33, 0.0  ;;  %v4388_v10 = vpop.f32.mrb[32].mxu1 }
 0x44b   : > { %3521 = vst.msk [vmem:[%s4869_s19 + $0x58] sm:$0xff] %vm348_vm1, %v3505_v16  ;;  %v3469_v18 = vadd.f32 %v4388_v10, %v3453_v45  ;;  %v3408_v19 = vpop.f32.mrb[33].mxu1 }
 0x44c   : > { %3519 = vst.msk [vmem:[%s4869_s19 + $0x48] sm:$0xff] %vm348_vm1, %v3503_v41  ;;  %v3467_v25 = vadd.f32 %v3451_v60, %v3408_v19  ;;  %v4389_v48 = vpop.f32.mrb[34].mxu1 }
 0x44d   : > { %v3492_v54 = vadd.f32 %v5723_v47, %v3469_v18  ;;  %v3470_v4 = vadd.f32 %v4389_v48, %v3454_v43  ;;  %v3411_v50 = vpop.f32.mrb[35].mxu1 }
 0x44e   : > { %v3490_v63 = vadd.f32 %v5723_v47, %v3467_v25  ;;  %v3468_v55 = vadd.f32 %v3452_v52, %v3411_v50 }
 0x44f   : > { %v3508_v58 = vmax.f32 %v3492_v54, 0.0  ;;  %v3493_v26 = vadd.f32 %v5723_v47, %v3470_v4 }
 0x450   : > { %v3506_v27 = vmax.f32 %v3490_v63, 0.0  ;;  %v3491_v30 = vadd.f32 %v5723_v47, %v3468_v55 }
 0x451   : > { %3524 = vst.msk [vmem:[%s4869_s19 + $0x70] sm:$0xff] %vm348_vm1, %v3508_v58  ;;  %v3509_v3 = vmax.f32 %v3493_v26, 0.0 }
 0x452   : > { %3522 = vst.msk [vmem:[%s4869_s19 + $0x60] sm:$0xff] %vm348_vm1, %v3506_v27  ;;  %v3507_v8 = vmax.f32 %v3491_v30, 0.0 }
 0x453   : > { %3525 = vst.msk [vmem:[%s4869_s19 + $0x78] sm:$0xff] %vm348_vm1, %v3509_v3 }
 0x454   : > { %3523 = vst.msk [vmem:[%s4869_s19 + $0x68] sm:$0xff] %vm348_vm1, %v3507_v8 }
 0x455 PF: > { %s16_s25 = sadd.s32 1, %s4774_s25   ;;  %s5809_s21 = smov %s4766_s23 }
 0x456   : > { %p13_p10 = scmp.ge.s32.totalorder %s16_s25, 6   ;;  %s5810_s22 = smov %s4770_s24 }
 0x457   : > { %s5811_s23 = smov %s5814_s26  ;;  %s5812_s24 = smov %s5818_s27 }
 0x458   :  { %15 = sbr.rel (!%p13_p10) target bundleno = 3 (0x3), region = 107 }

</bundles_post_ra>
